<compile_context>
chip_gen: v6e
topology: v6e:2x2x1
jax: 0.10.0
libtpu: 0.0.40
codegen_flags: <defaults>
</compile_context>

<pallas_src>
import jax
import jax.numpy as jnp
from jax.experimental import pallas as pl
from jax.experimental.pallas import tpu as pltpu


def _round_up(n, m):
    return ((n + m - 1) // m) * m


# ----------------------------------------------------------------------------
# Kernel
# ----------------------------------------------------------------------------
def aixia_kernel(
    img_ref,        # [TB, K_CHUNK]        bf16
    w_fused_ref,    # [K_CHUNK, HID_PAD]   bf16  (= w_vit @ pca_comp_t, padded)
    b_fused_ref,    # [1, HID_PAD]         f32   (= (b_vit - mu) @ comp_t)
    nodes_bias_ref, # [1, SEQ_PAD]         f32   (= kg.flatten() @ W_nodes + b_seq)
    w_seq_img_ref,  # [HID_PAD, SEQ_PAD]   bf16
    w_head_ref,     # [SEQ_PAD, OUT_PAD]   bf16
    b_head_ref,     # [1, OUT_PAD]         f32
    out_ref,        # [TB, OUT_PAD]        f32
    acc_ref,        # VMEM scratch [TB, HID_PAD] f32
):
    f32 = jnp.float32
    k = pl.program_id(1)

    @pl.when(k == 0)
    def _():
        acc_ref[...] = jnp.zeros_like(acc_ref)

    # ---- ViT stub + PCA.transform, fused into one projection; accumulate
    # over img_dim K-chunks (bf16 MXU operands, f32 accumulation). ------------
    # TODO(synk): pretrained ViT backbone replaced by a deterministic linear stub.
    acc_ref[...] += jnp.dot(img_ref[...], w_fused_ref[...],
                            preferred_element_type=f32)

    @pl.when(k == pl.num_programs(1) - 1)
    def _():
        img_feats = acc_ref[...] + b_fused_ref[...]               # [TB, HID_PAD]

        # seq: x = cat([img_feats, nodes]); Linear + LeakyReLU(0.2).
        # The node columns are identical for every batch row (== .repeat(B, 1))
        # and were pre-contracted host-side into nodes_bias.
        h = (jnp.dot(img_feats.astype(jnp.bfloat16), w_seq_img_ref[...],
                     preferred_element_type=f32)
             + nodes_bias_ref[...])                               # [TB, SEQ_PAD]
        h = jnp.where(h >= 0, h, 0.2 * h)                         # LeakyReLU(0.2)

        # head (lane-padded; the zero padding is sliced off in the wrapper).
        out_ref[...] = (jnp.dot(h.astype(jnp.bfloat16), w_head_ref[...],
                                preferred_element_type=f32)
                        + b_head_ref[...])                        # [TB, OUT_PAD]


# ----------------------------------------------------------------------------
# One-time parameter preparation (NOT per forward call)
# ----------------------------------------------------------------------------
def prepare_params(params, *, n_style, k_chunk_max=4096):
    """Fuse ViT stub + PCA into one projection, pad feature axes to 128-lane
    multiples, cast MXU weights to bf16, and fix the img-dim K-tiling."""
    f32, bf16 = jnp.float32, jnp.bfloat16

    img_dim = params["w_vit"].shape[0]
    hidden = params["pca_comp_t"].shape[1]
    seq_out = params["b_seq"].shape[1]
    out_ch = params["w_head"].shape[1]

    hid_pad = _round_up(hidden, 128)
    seq_pad = _round_up(seq_out, 128)
    out_pad = _round_up(out_ch, 128)
    k_chunk = min(_round_up(img_dim, 128), k_chunk_max)
    k_pad = _round_up(img_dim, k_chunk)

    def pad(x, rows, cols):
        return jnp.pad(x, ((0, rows - x.shape[0]), (0, cols - x.shape[1])))

    # (x @ Wv + bv - mu) @ C  ==  x @ (Wv @ C) + (bv - mu) @ C
    w_fused = params["w_vit"] @ params["pca_comp_t"]
    b_fused = (params["b_vit"] - params["pca_mean"]) @ params["pca_comp_t"]

    # The PyTorch module implicitly requires kg.flatten() to line up with the
    # node columns of the seq layer; check the requirement explicitly.
    assert params["w_seq_nodes"].shape[0] == n_style * hidden, (
        "kg.flatten() length must match the node part of W_seq")

    return dict(
        img_dim=img_dim, hidden=hidden, seq_out=seq_out, out_ch=out_ch,
        hid_pad=hid_pad, seq_pad=seq_pad, out_pad=out_pad,
        k_chunk=k_chunk, k_pad=k_pad,
        # kernel operands (padded; MXU weights in bf16, biases f32)
        w_fused=pad(w_fused, k_pad, hid_pad).astype(bf16),
        b_fused=pad(b_fused.astype(f32), 1, hid_pad),
        w_seq_img=pad(params["w_seq_img"].astype(f32), hid_pad, seq_pad).astype(bf16),
        w_head=pad(params["w_head"].astype(f32), seq_pad, out_pad).astype(bf16),
        b_head=pad(params["b_head"].astype(f32), 1, out_pad),
        # node-path parameters (host-side per forward; tiny shapes)
        w_root=params["w_root"].astype(f32),
        w_nbr=params["w_nbr"].astype(f32),
        b_gnn=params["b_gnn"].astype(f32),
        w_seq_nodes=params["w_seq_nodes"].astype(f32),
        b_seq=params["b_seq"].astype(f32),
    )


# ----------------------------------------------------------------------------
# Forward wrapper
# ----------------------------------------------------------------------------
def aixia_forward(img, x_dict, edge_index_dict, prep):
    """JAX wrapper reproducing AIxIAModel.forward (num_layers=1, target='style')."""
    f32, bf16 = jnp.float32, jnp.bfloat16
    B = img.shape[0]
    hid_pad, seq_pad, out_pad = prep["hid_pad"], prep["seq_pad"], prep["out_pad"]
    k_chunk, k_pad = prep["k_chunk"], prep["k_pad"]

    # ---- glue: NCHW flatten, pad batch to >=16 rows (bf16 sublane group) and
    # the feature axis up to the K-tiling; bf16 for the HBM-dominant stream.
    img_flat = img.reshape(B, -1)
    assert img_flat.shape[1] == prep["img_dim"]
    b_pad = max(_round_up(B, 16), 16)
    tb = min(b_pad, 256)                 # 256-row MXU on v6e/v7x; multiple of 16
    b_pad = _round_up(b_pad, tb)
    img_flat = jnp.pad(
        img_flat, ((0, b_pad - B), (0, k_pad - img_flat.shape[1]))).astype(bf16)

    # ---- grid-invariant node path, hoisted out of the kernel (identical for
    # every batch row, i.e. nodes.repeat(B, 1)).  Shapes are tiny (n_style x
    # hidden), far below MXU tile size, so plain XLA is the right place.
    # TODO(synk): to_hetero(gnn) replaced by one dense mean-aggregation conv.
    x_style = x_dict["style"].astype(f32)
    x_art = x_dict["artwork"].astype(f32)
    edge_index = edge_index_dict[("artwork", "to", "style")]      # [2, E]
    n_style, n_art = x_style.shape[0], x_art.shape[0]
    src, dst = edge_index[0], edge_index[1]
    # scatter-ADD so duplicate edges keep multiplicity (matches PyG mean agg).
    adj = jnp.zeros((n_style, n_art), f32).at[dst, src].add(1.0)
    deg = jnp.maximum(adj.sum(axis=1, keepdims=True), 1.0)
    adj = adj / deg
    nbr = adj @ x_art
    kg = x_style @ prep["w_root"] + nbr @ prep["w_nbr"] + prep["b_gnn"]
    kg_flat = kg.reshape(1, -1)                    # row-major == torch flatten()
    nodes_bias = kg_flat @ prep["w_seq_nodes"] + prep["b_seq"]    # [1, seq_out]
    nodes_bias = jnp.pad(nodes_bias,
                         ((0, 0), (0, seq_pad - nodes_bias.shape[1])))

    grid = (b_pad // tb, k_pad // k_chunk)

    # ---- explicit VMEM budget: tile + double-buffer footprint, with headroom.
    est = (2 * tb * k_chunk * 2            # img block (bf16, double-buffered)
           + 2 * k_chunk * hid_pad * 2     # w_fused block (bf16, double-buffered)
           + 2 * (hid_pad + seq_pad + out_pad) * 4   # bias rows
           + 2 * hid_pad * seq_pad * 2     # w_seq_img
           + 2 * seq_pad * out_pad * 2     # w_head
           + 2 * tb * out_pad * 4          # out block
           + tb * hid_pad * 4)             # acc scratch
    vmem_limit = int(min(max(2 * est, 16 * 2 ** 20), 64 * 2 ** 20))

    def run(single_buffer):
        # Grid-invariant broadcast operands: block index never changes, so
        # single-buffer them (halves their VMEM footprint; matters most on
        # v7x's 64 MiB VMEM).
        bcast_kw = dict(pipeline_mode=pl.Buffered(1)) if single_buffer else {}

        def bcast(shape):
            return pl.BlockSpec(shape, lambda i, k: (0, 0), **bcast_kw)

        return pl.pallas_call(
            aixia_kernel,
            out_shape=jax.ShapeDtypeStruct((b_pad, out_pad), f32),
            grid=grid,
            in_specs=[
                pl.BlockSpec((tb, k_chunk), lambda i, k: (i, k)),      # img
                pl.BlockSpec((k_chunk, hid_pad), lambda i, k: (k, 0)), # w_fused
                bcast((1, hid_pad)),           # b_fused
                bcast((1, seq_pad)),           # nodes_bias (+ b_seq)
                bcast((hid_pad, seq_pad)),     # w_seq_img
                bcast((seq_pad, out_pad)),     # w_head
                bcast((1, out_pad)),           # b_head
            ],
            out_specs=pl.BlockSpec((tb, out_pad), lambda i, k: (i, 0)),
            scratch_shapes=[pltpu.VMEM((tb, hid_pad), f32)],
            compiler_params=pltpu.CompilerParams(
                dimension_semantics=("parallel", "arbitrary"),
                vmem_limit_bytes=vmem_limit),
        )(img_flat, prep["w_fused"], prep["b_fused"], nodes_bias,
          prep["w_seq_img"], prep["w_head"], prep["b_head"])

    try:
        out_padded = run(single_buffer=True)
    except Exception:
        # TODO(synk): this jax build rejects pl.Buffered(1) single-buffering;
        # fall back to default double-buffered broadcast specs.
        out_padded = run(single_buffer=False)

    return out_padded[:B, :prep["out_ch"]]     # glue: drop batch / lane padding


# ----------------------------------------------------------------------------
# Deterministic synthetic parameters (shapes implied by AIxIAModel.__init__,
# num_layers=1).
# ----------------------------------------------------------------------------
def _uniform(key, shape, fan_in):
    bound = 1.0 / (fan_in ** 0.5)
    return jax.random.uniform(key, shape, jnp.float32, -bound, bound)


def init_params(key, *, img_dim, vit_dim, hidden_dim, node_in, out_channels):
    ks = jax.random.split(key, 10)
    in_feats = hidden_dim + hidden_dim * out_channels           # seq input width
    seq_out = in_feats // 2                                     # num_layers = 1
    # W_seq stored already transposed ([in, out]); split into image / node parts.
    w_seq_t = _uniform(ks[6], (in_feats, seq_out), in_feats)
    return dict(
        w_vit=_uniform(ks[0], (img_dim, vit_dim), img_dim),
        b_vit=_uniform(ks[1], (1, vit_dim), img_dim),
        pca_mean=jax.random.normal(ks[2], (1, vit_dim), jnp.float32),
        pca_comp_t=jax.random.normal(ks[3], (vit_dim, hidden_dim),
                                     jnp.float32) / (vit_dim ** 0.5),
        w_root=_uniform(ks[4], (node_in, hidden_dim), node_in),
        w_nbr=_uniform(ks[5], (node_in, hidden_dim), node_in),
        b_gnn=jnp.zeros((1, hidden_dim), jnp.float32),
        w_seq_img=w_seq_t[:hidden_dim],        # [hidden, seq_out]
        w_seq_nodes=w_seq_t[hidden_dim:],      # [hidden*out_ch, seq_out] flat,
                                               #   row-major == kg.flatten() order
        b_seq=_uniform(ks[7], (1, seq_out), in_feats),
        w_head=_uniform(ks[8], (seq_out, out_channels), seq_out),
        b_head=_uniform(ks[9], (1, out_channels), seq_out),
    )


if __name__ == "__main__":
    key = jax.random.PRNGKey(0)
    B, C, H, W = 2, 4, 16, 16
    VIT_DIM, HIDDEN, OUT_CH, NODE_IN = 192, 32, 4, 16
    N_STYLE, N_ART = OUT_CH, 6       # flatten(style nodes) == HIDDEN * OUT_CH

    keys = jax.random.split(key, 4)
    img = jax.random.normal(keys[0], (B, C, H, W), jnp.float32)
    x_dict = {
        "style": jax.random.normal(keys[1], (N_STYLE, NODE_IN), jnp.float32),
        "artwork": jax.random.normal(keys[2], (N_ART, NODE_IN), jnp.float32),
    }
    # deterministic bipartite edges: artwork -> style
    src = jnp.array([0, 1, 2, 3, 4, 5, 0, 3], jnp.int32)
    dst = jnp.array([0, 0, 1, 1, 2, 2, 3, 3], jnp.int32)
    edge_index_dict = {("artwork", "to", "style"): jnp.stack([src, dst])}

    params = init_params(keys[3], img_dim=C * H * W, vit_dim=VIT_DIM,
                         hidden_dim=HIDDEN, node_in=NODE_IN,
                         out_channels=OUT_CH)
    prep = prepare_params(params, n_style=N_STYLE)   # one-time, outside forward

    out = aixia_forward(img, x_dict, edge_index_dict, prep)
    out = jax.block_until_ready(out)
    assert out.shape == (B, OUT_CH) and out.dtype == jnp.float32
    assert bool(jnp.all(jnp.isfinite(out)))
    print("KERNEL_OK")
</pallas_src>

<mosaic_0001>
module attributes {stable_mosaic.version = 11 : i64} {
  func.func @aixia_kernel(%arg0: i32, %arg1: i32, %arg2: memref<16x1024xbf16, #tpu.memory_space<vmem>>, %arg3: memref<1024x128xbf16, #tpu.memory_space<vmem>>, %arg4: memref<1x128xf32, #tpu.memory_space<vmem>>, %arg5: memref<1x128xf32, #tpu.memory_space<vmem>>, %arg6: memref<128x128xbf16, #tpu.memory_space<vmem>>, %arg7: memref<128x128xbf16, #tpu.memory_space<vmem>>, %arg8: memref<1x128xf32, #tpu.memory_space<vmem>>, %arg9: memref<16x128xf32, #tpu.memory_space<vmem>>, %arg10: memref<16x128xf32, #tpu.memory_space<vmem>>) attributes {dimension_semantics = [#tpu.dimension_semantics<parallel>, #tpu.dimension_semantics<arbitrary>], iteration_bounds = array<i64: 1, 1>, scalar_prefetch = 0 : i64, scratch_operands = 1 : i64, tpu.core_type = #tpu.core_type<tc>, window_params = [{transform_indices = @transform_0, window_bounds = array<i64: 16, 1024>}, {transform_indices = @transform_1, window_bounds = array<i64: 1024, 128>}, {pipeline_mode = #tpu.pipeline_mode<synchronous>, transform_indices = @transform_2, window_bounds = array<i64: 1, 128>}, {pipeline_mode = #tpu.pipeline_mode<synchronous>, transform_indices = @transform_3, window_bounds = array<i64: 1, 128>}, {pipeline_mode = #tpu.pipeline_mode<synchronous>, transform_indices = @transform_4, window_bounds = array<i64: 128, 128>}, {pipeline_mode = #tpu.pipeline_mode<synchronous>, transform_indices = @transform_5, window_bounds = array<i64: 128, 128>}, {pipeline_mode = #tpu.pipeline_mode<synchronous>, transform_indices = @transform_6, window_bounds = array<i64: 1, 128>}, {transform_indices = @transform_7, window_bounds = array<i64: 16, 128>}]} {
    %c0_i32 = arith.constant 0 : i32
    %0 = arith.cmpi eq, %arg1, %c0_i32 : i32
    %1 = arith.extui %0 : i1 to i32
    %c0_i32_0 = arith.constant 0 : i32
    %2 = arith.cmpi ne, %1, %c0_i32_0 : i32
    scf.if %2 {
      %cst_10 = arith.constant 0.000000e+00 : f32
      %12 = vector.broadcast %cst_10 : f32 to vector<16x128xf32>
      %c0_11 = arith.constant 0 : index
      %c0_12 = arith.constant 0 : index
      %13 = vector.load %arg10[%c0_11, %c0_12] : memref<16x128xf32, #tpu.memory_space<vmem>>, vector<16x128xf32>
      tpu.vector_store %arg10[%c0_11, %c0_12], %12 {strides = array<i32>} : memref<16x128xf32, #tpu.memory_space<vmem>>, vector<16x128xf32>,
    } else {
    }
    %c0 = arith.constant 0 : index
    %c0_1 = arith.constant 0 : index
    %3 = vector.load %arg10[%c0, %c0_1] : memref<16x128xf32, #tpu.memory_space<vmem>>, vector<16x128xf32>
    %c0_2 = arith.constant 0 : index
    %c0_3 = arith.constant 0 : index
    %4 = vector.load %arg2[%c0_2, %c0_3] : memref<16x1024xbf16, #tpu.memory_space<vmem>>, vector<16x1024xbf16>
    %c0_4 = arith.constant 0 : index
    %c0_5 = arith.constant 0 : index
    %5 = vector.load %arg3[%c0_4, %c0_5] : memref<1024x128xbf16, #tpu.memory_space<vmem>>, vector<1024x128xbf16>
    %cst = arith.constant dense<0.000000e+00> : vector<16x128xf32>
    %6 = tpu.matmul %4, %5, %cst {dimension_numbers = #tpu.dot_dimension_numbers<[1], [0], [0], [1], [0, 0, 1, 1], [], []>} : vector<16x1024xbf16>, vector<1024x128xbf16>, vector<16x128xf32> -> vector<16x128xf32>
    %7 = arith.addf %3, %6 : vector<16x128xf32>
    %c0_6 = arith.constant 0 : index
    %c0_7 = arith.constant 0 : index
    %8 = vector.load %arg10[%c0_6, %c0_7] : memref<16x128xf32, #tpu.memory_space<vmem>>, vector<16x128xf32>
    tpu.vector_store %arg10[%c0_6, %c0_7], %7 {strides = array<i32>} : memref<16x128xf32, #tpu.memory_space<vmem>>, vector<16x128xf32>,
    %c0_i32_8 = arith.constant 0 : i32
    %9 = arith.cmpi eq, %arg1, %c0_i32_8 : i32
    %10 = arith.extui %9 : i1 to i32
    %c0_i32_9 = arith.constant 0 : i32
    %11 = arith.cmpi ne, %10, %c0_i32_9 : i32
    scf.if %11 {
      %c0_10 = arith.constant 0 : index
      %c0_11 = arith.constant 0 : index
      %12 = vector.load %arg10[%c0_10, %c0_11] : memref<16x128xf32, #tpu.memory_space<vmem>>, vector<16x128xf32>
      %c0_12 = arith.constant 0 : index
      %c0_13 = arith.constant 0 : index
      %13 = vector.load %arg4[%c0_12, %c0_13] : memref<1x128xf32, #tpu.memory_space<vmem>>, vector<1x128xf32>
      %14 = vector.broadcast %13 : vector<1x128xf32> to vector<16x128xf32>
      %15 = arith.addf %12, %14 : vector<16x128xf32>
      %16 = arith.truncf %15 : vector<16x128xf32> to vector<16x128xbf16>
      %c0_14 = arith.constant 0 : index
      %c0_15 = arith.constant 0 : index
      %17 = vector.load %arg6[%c0_14, %c0_15] : memref<128x128xbf16, #tpu.memory_space<vmem>>, vector<128x128xbf16>
      %cst_16 = arith.constant dense<0.000000e+00> : vector<16x128xf32>
      %18 = tpu.matmul %16, %17, %cst_16 {dimension_numbers = #tpu.dot_dimension_numbers<[1], [0], [0], [1], [0, 0, 1, 1], [], []>} : vector<16x128xbf16>, vector<128x128xbf16>, vector<16x128xf32> -> vector<16x128xf32>
      %c0_17 = arith.constant 0 : index
      %c0_18 = arith.constant 0 : index
      %19 = vector.load %arg5[%c0_17, %c0_18] : memref<1x128xf32, #tpu.memory_space<vmem>>, vector<1x128xf32>
      %20 = vector.broadcast %19 : vector<1x128xf32> to vector<16x128xf32>
      %21 = arith.addf %18, %20 : vector<16x128xf32>
      %cst_19 = arith.constant 0.000000e+00 : f32
      %22 = vector.broadcast %cst_19 : f32 to vector<16x128xf32>
      %23 = arith.cmpf oge, %21, %22 : vector<16x128xf32>
      %cst_20 = arith.constant 2.000000e-01 : f32
      %24 = vector.broadcast %cst_20 : f32 to vector<16x128xf32>
      %25 = arith.mulf %24, %21 : vector<16x128xf32>
      %26 = arith.select %23, %21, %25 : vector<16x128xi1>, vector<16x128xf32>
      %27 = arith.truncf %26 : vector<16x128xf32> to vector<16x128xbf16>
      %c0_21 = arith.constant 0 : index
      %c0_22 = arith.constant 0 : index
      %28 = vector.load %arg7[%c0_21, %c0_22] : memref<128x128xbf16, #tpu.memory_space<vmem>>, vector<128x128xbf16>
      %cst_23 = arith.constant dense<0.000000e+00> : vector<16x128xf32>
      %29 = tpu.matmul %27, %28, %cst_23 {dimension_numbers = #tpu.dot_dimension_numbers<[1], [0], [0], [1], [0, 0, 1, 1], [], []>} : vector<16x128xbf16>, vector<128x128xbf16>, vector<16x128xf32> -> vector<16x128xf32>
      %c0_24 = arith.constant 0 : index
      %c0_25 = arith.constant 0 : index
      %30 = vector.load %arg8[%c0_24, %c0_25] : memref<1x128xf32, #tpu.memory_space<vmem>>, vector<1x128xf32>
      %31 = vector.broadcast %30 : vector<1x128xf32> to vector<16x128xf32>
      %32 = arith.addf %29, %31 : vector<16x128xf32>
      %c0_26 = arith.constant 0 : index
      %c0_27 = arith.constant 0 : index
      %33 = vector.load %arg9[%c0_26, %c0_27] : memref<16x128xf32, #tpu.memory_space<vmem>>, vector<16x128xf32>
      tpu.vector_store %arg9[%c0_26, %c0_27], %32 {strides = array<i32>} : memref<16x128xf32, #tpu.memory_space<vmem>>, vector<16x128xf32>,
    } else {
    }
    return
  }
  func.func @transform_0(%arg0: i32, %arg1: i32) -> (i32, i32) {
    %c0_i32 = arith.constant 0 : i32
    return %arg0, %arg1 : i32, i32
  }
  func.func @transform_1(%arg0: i32, %arg1: i32) -> (i32, i32) {
    %c0_i32 = arith.constant 0 : i32
    %c0_i32_0 = arith.constant 0 : i32
    return %arg1, %c0_i32 : i32, i32
  }
  func.func @transform_2(%arg0: i32, %arg1: i32) -> (i32, i32) {
    %c0_i32 = arith.constant 0 : i32
    %c0_i32_0 = arith.constant 0 : i32
    %c0_i32_1 = arith.constant 0 : i32
    return %c0_i32, %c0_i32_0 : i32, i32
  }
  func.func @transform_3(%arg0: i32, %arg1: i32) -> (i32, i32) {
    %c0_i32 = arith.constant 0 : i32
    %c0_i32_0 = arith.constant 0 : i32
    %c0_i32_1 = arith.constant 0 : i32
    return %c0_i32, %c0_i32_0 : i32, i32
  }
  func.func @transform_4(%arg0: i32, %arg1: i32) -> (i32, i32) {
    %c0_i32 = arith.constant 0 : i32
    %c0_i32_0 = arith.constant 0 : i32
    %c0_i32_1 = arith.constant 0 : i32
    return %c0_i32, %c0_i32_0 : i32, i32
  }
  func.func @transform_5(%arg0: i32, %arg1: i32) -> (i32, i32) {
    %c0_i32 = arith.constant 0 : i32
    %c0_i32_0 = arith.constant 0 : i32
    %c0_i32_1 = arith.constant 0 : i32
    return %c0_i32, %c0_i32_0 : i32, i32
  }
  func.func @transform_6(%arg0: i32, %arg1: i32) -> (i32, i32) {
    %c0_i32 = arith.constant 0 : i32
    %c0_i32_0 = arith.constant 0 : i32
    %c0_i32_1 = arith.constant 0 : i32
    return %c0_i32, %c0_i32_0 : i32, i32
  }
  func.func @transform_7(%arg0: i32, %arg1: i32) -> (i32, i32) {
    %c0_i32 = arith.constant 0 : i32
    %c0_i32_0 = arith.constant 0 : i32
    return %arg0, %c0_i32 : i32, i32
  }
}

module attributes {stable_mosaic.version = 11 : i64} {
  func.func @aixia_kernel(%arg0: i32, %arg1: i32, %arg2: memref<16x1024xbf16, #tpu.memory_space<vmem>>, %arg3: memref<1024x128xbf16, #tpu.memory_space<vmem>>, %arg4: memref<1x128xf32, #tpu.memory_space<vmem>>, %arg5: memref<1x128xf32, #tpu.memory_space<vmem>>, %arg6: memref<128x128xbf16, #tpu.memory_space<vmem>>, %arg7: memref<128x128xbf16, #tpu.memory_space<vmem>>, %arg8: memref<1x128xf32, #tpu.memory_space<vmem>>, %arg9: memref<16x128xf32, #tpu.memory_space<vmem>>, %arg10: memref<16x128xf32, #tpu.memory_space<vmem>>) attributes {dimension_semantics = [#tpu.dimension_semantics<parallel>, #tpu.dimension_semantics<arbitrary>], iteration_bounds = array<i64: 1, 1>, scalar_prefetch = 0 : i64, scratch_operands = 1 : i64, tpu.core_type = #tpu.core_type<tc>, window_params = [{transform_indices = @transform_0, window_bounds = array<i64: 16, 1024>}, {transform_indices = @transform_1, window_bounds = array<i64: 1024, 128>}, {pipeline_mode = #tpu.pipeline_mode<synchronous>, transform_indices = @transform_2, window_bounds = array<i64: 1, 128>}, {pipeline_mode = #tpu.pipeline_mode<synchronous>, transform_indices = @transform_3, window_bounds = array<i64: 1, 128>}, {pipeline_mode = #tpu.pipeline_mode<synchronous>, transform_indices = @transform_4, window_bounds = array<i64: 128, 128>}, {pipeline_mode = #tpu.pipeline_mode<synchronous>, transform_indices = @transform_5, window_bounds = array<i64: 128, 128>}, {pipeline_mode = #tpu.pipeline_mode<synchronous>, transform_indices = @transform_6, window_bounds = array<i64: 1, 128>}, {transform_indices = @transform_7, window_bounds = array<i64: 16, 128>}]} {
    %c0_i32 = arith.constant 0 : i32
    %0 = arith.cmpi eq, %arg1, %c0_i32 : i32
    %1 = arith.extui %0 : i1 to i32
    %c0_i32_0 = arith.constant 0 : i32
    %2 = arith.cmpi ne, %1, %c0_i32_0 : i32
    scf.if %2 {
      %cst_10 = arith.constant 0.000000e+00 : f32
      %12 = vector.broadcast %cst_10 : f32 to vector<16x128xf32>
      %c0_11 = arith.constant 0 : index
      %c0_12 = arith.constant 0 : index
      %13 = vector.load %arg10[%c0_11, %c0_12] : memref<16x128xf32, #tpu.memory_space<vmem>>, vector<16x128xf32>
      tpu.vector_store %arg10[%c0_11, %c0_12], %12 {strides = array<i32>} : memref<16x128xf32, #tpu.memory_space<vmem>>, vector<16x128xf32>,
    } else {
    }
    %c0 = arith.constant 0 : index
    %c0_1 = arith.constant 0 : index
    %3 = vector.load %arg10[%c0, %c0_1] : memref<16x128xf32, #tpu.memory_space<vmem>>, vector<16x128xf32>
    %c0_2 = arith.constant 0 : index
    %c0_3 = arith.constant 0 : index
    %4 = vector.load %arg2[%c0_2, %c0_3] : memref<16x1024xbf16, #tpu.memory_space<vmem>>, vector<16x1024xbf16>
    %c0_4 = arith.constant 0 : index
    %c0_5 = arith.constant 0 : index
    %5 = vector.load %arg3[%c0_4, %c0_5] : memref<1024x128xbf16, #tpu.memory_space<vmem>>, vector<1024x128xbf16>
    %cst = arith.constant dense<0.000000e+00> : vector<16x128xf32>
    %6 = tpu.matmul %4, %5, %cst {dimension_numbers = #tpu.dot_dimension_numbers<[1], [0], [0], [1], [0, 0, 1, 1], [], []>} : vector<16x1024xbf16>, vector<1024x128xbf16>, vector<16x128xf32> -> vector<16x128xf32>
    %7 = arith.addf %3, %6 : vector<16x128xf32>
    %c0_6 = arith.constant 0 : index
    %c0_7 = arith.constant 0 : index
    %8 = vector.load %arg10[%c0_6, %c0_7] : memref<16x128xf32, #tpu.memory_space<vmem>>, vector<16x128xf32>
    tpu.vector_store %arg10[%c0_6, %c0_7], %7 {strides = array<i32>} : memref<16x128xf32, #tpu.memory_space<vmem>>, vector<16x128xf32>,
    %c0_i32_8 = arith.constant 0 : i32
    %9 = arith.cmpi eq, %arg1, %c0_i32_8 : i32
    %10 = arith.extui %9 : i1 to i32
    %c0_i32_9 = arith.constant 0 : i32
    %11 = arith.cmpi ne, %10, %c0_i32_9 : i32
    scf.if %11 {
      %c0_10 = arith.constant 0 : index
      %c0_11 = arith.constant 0 : index
      %12 = vector.load %arg10[%c0_10, %c0_11] : memref<16x128xf32, #tpu.memory_space<vmem>>, vector<16x128xf32>
      %c0_12 = arith.constant 0 : index
      %c0_13 = arith.constant 0 : index
      %13 = vector.load %arg4[%c0_12, %c0_13] : memref<1x128xf32, #tpu.memory_space<vmem>>, vector<1x128xf32>
      %14 = vector.broadcast %13 : vector<1x128xf32> to vector<16x128xf32>
      %15 = arith.addf %12, %14 : vector<16x128xf32>
      %16 = arith.truncf %15 : vector<16x128xf32> to vector<16x128xbf16>
      %c0_14 = arith.constant 0 : index
      %c0_15 = arith.constant 0 : index
      %17 = vector.load %arg6[%c0_14, %c0_15] : memref<128x128xbf16, #tpu.memory_space<vmem>>, vector<128x128xbf16>
      %cst_16 = arith.constant dense<0.000000e+00> : vector<16x128xf32>
      %18 = tpu.matmul %16, %17, %cst_16 {dimension_numbers = #tpu.dot_dimension_numbers<[1], [0], [0], [1], [0, 0, 1, 1], [], []>} : vector<16x128xbf16>, vector<128x128xbf16>, vector<16x128xf32> -> vector<16x128xf32>
      %c0_17 = arith.constant 0 : index
      %c0_18 = arith.constant 0 : index
      %19 = vector.load %arg5[%c0_17, %c0_18] : memref<1x128xf32, #tpu.memory_space<vmem>>, vector<1x128xf32>
      %20 = vector.broadcast %19 : vector<1x128xf32> to vector<16x128xf32>
      %21 = arith.addf %18, %20 : vector<16x128xf32>
      %cst_19 = arith.constant 0.000000e+00 : f32
      %22 = vector.broadcast %cst_19 : f32 to vector<16x128xf32>
      %23 = arith.cmpf oge, %21, %22 : vector<16x128xf32>
      %cst_20 = arith.constant 2.000000e-01 : f32
      %24 = vector.broadcast %cst_20 : f32 to vector<16x128xf32>
      %25 = arith.mulf %24, %21 : vector<16x128xf32>
      %26 = arith.select %23, %21, %25 : vector<16x128xi1>, vector<16x128xf32>
      %27 = arith.truncf %26 : vector<16x128xf32> to vector<16x128xbf16>
      %c0_21 = arith.constant 0 : index
      %c0_22 = arith.constant 0 : index
      %28 = vector.load %arg7[%c0_21, %c0_22] : memref<128x128xbf16, #tpu.memory_space<vmem>>, vector<128x128xbf16>
      %cst_23 = arith.constant dense<0.000000e+00> : vector<16x128xf32>
      %29 = tpu.matmul %27, %28, %cst_23 {dimension_numbers = #tpu.dot_dimension_numbers<[1], [0], [0], [1], [0, 0, 1, 1], [], []>} : vector<16x128xbf16>, vector<128x128xbf16>, vector<16x128xf32> -> vector<16x128xf32>
      %c0_24 = arith.constant 0 : index
      %c0_25 = arith.constant 0 : index
      %30 = vector.load %arg8[%c0_24, %c0_25] : memref<1x128xf32, #tpu.memory_space<vmem>>, vector<1x128xf32>
      %31 = vector.broadcast %30 : vector<1x128xf32> to vector<16x128xf32>
      %32 = arith.addf %29, %31 : vector<16x128xf32>
      %c0_26 = arith.constant 0 : index
      %c0_27 = arith.constant 0 : index
      %33 = vector.load %arg9[%c0_26, %c0_27] : memref<16x128xf32, #tpu.memory_space<vmem>>, vector<16x128xf32>
      tpu.vector_store %arg9[%c0_26, %c0_27], %32 {strides = array<i32>} : memref<16x128xf32, #tpu.memory_space<vmem>>, vector<16x128xf32>,
    } else {
    }
    return
  }
  func.func @transform_0(%arg0: i32, %arg1: i32) -> (i32, i32) {
    %c0_i32 = arith.constant 0 : i32
    return %arg0, %arg1 : i32, i32
  }
  func.func @transform_1(%arg0: i32, %arg1: i32) -> (i32, i32) {
    %c0_i32 = arith.constant 0 : i32
    %c0_i32_0 = arith.constant 0 : i32
    return %arg1, %c0_i32 : i32, i32
  }
  func.func @transform_2(%arg0: i32, %arg1: i32) -> (i32, i32) {
    %c0_i32 = arith.constant 0 : i32
    %c0_i32_0 = arith.constant 0 : i32
    %c0_i32_1 = arith.constant 0 : i32
    return %c0_i32, %c0_i32_0 : i32, i32
  }
  func.func @transform_3(%arg0: i32, %arg1: i32) -> (i32, i32) {
    %c0_i32 = arith.constant 0 : i32
    %c0_i32_0 = arith.constant 0 : i32
    %c0_i32_1 = arith.constant 0 : i32
    return %c0_i32, %c0_i32_0 : i32, i32
  }
  func.func @transform_4(%arg0: i32, %arg1: i32) -> (i32, i32) {
    %c0_i32 = arith.constant 0 : i32
    %c0_i32_0 = arith.constant 0 : i32
    %c0_i32_1 = arith.constant 0 : i32
    return %c0_i32, %c0_i32_0 : i32, i32
  }
  func.func @transform_5(%arg0: i32, %arg1: i32) -> (i32, i32) {
    %c0_i32 = arith.constant 0 : i32
    %c0_i32_0 = arith.constant 0 : i32
    %c0_i32_1 = arith.constant 0 : i32
    return %c0_i32, %c0_i32_0 : i32, i32
  }
  func.func @transform_6(%arg0: i32, %arg1: i32) -> (i32, i32) {
    %c0_i32 = arith.constant 0 : i32
    %c0_i32_0 = arith.constant 0 : i32
    %c0_i32_1 = arith.constant 0 : i32
    return %c0_i32, %c0_i32_0 : i32, i32
  }
  func.func @transform_7(%arg0: i32, %arg1: i32) -> (i32, i32) {
    %c0_i32 = arith.constant 0 : i32
    %c0_i32_0 = arith.constant 0 : i32
    return %arg0, %c0_i32 : i32, i32
  }
}

</mosaic_0001>

<bundles_post_ra>
// kernel: tpu_custom_call.1
= control target key start
LH: loop header
LB: loop body
LE: loop exit
PB: predicated region body
PF: predicated region fallthrough
CT: control target
= control target key end

     0   :  { %12 = vsyncpa [#allocation4], 0  ;;  %s1628_s0 = inlined_call_operand.hbm [shape: bf16[16,1024], index: 0, kind: input, shape index: {}]   ;;  %s1629_s1 = inlined_call_operand.hbm [shape: bf16[1024,128], index: 1, kind: input, shape index: {}]   ;;  %s1630_s2 = inlined_call_operand.vmem [shape: f32[1,128], index: 2, kind: input, shape index: {}]   ;;  %s1631_s3 = inlined_call_operand.vmem [shape: f32[1,128], index: 3, kind: input, shape index: {}]   ;;  %s1632_s4 = inlined_call_operand.hbm [shape: bf16[128,128], index: 4, kind: input, shape index: {}]   ;;  %s1633_s5 = inlined_call_operand.hbm [shape: bf16[128,128], index: 5, kind: input, shape index: {}]   ;;  %s1634_s6 = inlined_call_operand.vmem [shape: f32[1,128], index: 6, kind: input, shape index: {}]   ;;  %s1635_s7 = inlined_call_operand.hbm [shape: f32[16,128], index: 7, kind: output, shape index: {}]  }
   0x1   :  { %13 = vsyncpa [#allocation7], 0 }
   0x2   :  { %14 = vsyncpa [#allocation10], 0 }
   0x3   :  { %15 = vsyncpa [#allocation5], 0  ;;  %s1524_s24 = smov [#allocation6]  }
   0x4   :  { %s33_s25 = sshll.u32 %s1524_s24, 4  ;;  %s34_s25 = int_to_ptr.vmem [resolvable:$true] %s33_s25 }
   0x5   :  { %s1424_s26 = scalar_lea.vmem %s34_s25, 8192  ;;  %p1429_p1 = scmp.lt.s32.totalorder %s34_s25, %s34_s25 }
   0x6   :  { %p1425_p0 = scmp.ne.s32.totalorder %s34_s25, %s1424_s26  ;;  %p1430_p2 = scmp.lt.s32.totalorder %s1424_s26, %s1424_s26 }
   0x8   :  { %p1431_p3 = por %p1430_p2, %p1429_p1 }
   0xa   :  { %p1432_p4 = pnand %p1431_p3, %p1425_p0 }
   0xc   :  { %1435 = shalt.err (!%p1432_p4)
}
   0xd   :  { %s1525_s27 = smov 64   ;;  %s1526_s28 = smov 4  }
   0xe   :  { %39 = dma.hbm_to_vmem [thread:$0]  %s1629_s1, 8192, %s34_s25, [#allocation7], %s1525_s27, %s1525_s27, %s1526_s28  }
   0xf   :  { %s1527_s8 = smov [#allocation3]  }
  0x10   :  { %s21_s9 = sshll.u32 %s1527_s8, 4  ;;  %s22_s9 = int_to_ptr.vmem [resolvable:$true] %s21_s9 }
  0x11   :  { %s1444_s10 = scalar_lea.vmem %s22_s9, 1024  ;;  %p1449_p6 = scmp.lt.s32.totalorder %s22_s9, %s22_s9 }
  0x12   :  { %p1445_p5 = scmp.ne.s32.totalorder %s22_s9, %s1444_s10  ;;  %p1450_p7 = scmp.lt.s32.totalorder %s1444_s10, %s1444_s10 }
  0x14   :  { %p1451_p8 = por %p1450_p7, %p1449_p6 }
  0x16   :  { %p1452_p9 = pnand %p1451_p8, %p1445_p5 }
  0x18   :  { %1455 = shalt.err (!%p1452_p9)
}
  0x19   :  { %s1528_s11 = smov 512   ;;  %s1529_s12 = smov 32  }
  0x1a   :  { %27 = dma.hbm_to_vmem [thread:$0]  %s1628_s0, 1024, %s22_s9, [#allocation4], %s1528_s11, %s1528_s11, %s1529_s12  }
  0x1b   :  { %s1530_s15 = smov [#allocation8]   ;;  %s1531_s17 = smov [#allocation9]  }
  0x1c   :  { %s49_s16 = sshll.u32 %s1530_s15, 4  ;;  %s61_s1 = sshll.u32 %s1531_s17, 4  ;;  %s50_s16 = int_to_ptr.vmem [resolvable:$true] %s49_s16  ;;  %s62_s1 = int_to_ptr.vmem [resolvable:$true] %s61_s1 }
  0x1d   :  { %s1464_s18 = scalar_lea.vmem %s50_s16, 1024  ;;  %p1469_p11 = scmp.lt.s32.totalorder %s50_s16, %s50_s16 }
  0x1e   :  { %p1465_p10 = scmp.ne.s32.totalorder %s50_s16, %s1464_s18  ;;  %p1470_p12 = scmp.lt.s32.totalorder %s1464_s18, %s1464_s18 }
  0x20   :  { %p1471_p13 = por %p1470_p12, %p1469_p11 }
  0x22   :  { %p1472_p0 = pnand %p1471_p13, %p1465_p10 }
  0x24   :  { %1475 = shalt.err (!%p1472_p0)
}
  0x25   :  { %55 = dma.hbm_to_vmem [thread:$0]  %s1632_s4, 1024, %s50_s16, [#allocation7], %s1525_s27, %s1525_s27, %s1526_s28  }
  0x26   :  { %s1484_s0 = scalar_lea.vmem %s62_s1, 1024  ;;  %p1489_p2 = scmp.lt.s32.totalorder %s62_s1, %s62_s1 }
  0x27   :  { %p1485_p1 = scmp.ne.s32.totalorder %s62_s1, %s1484_s0  ;;  %p1490_p3 = scmp.lt.s32.totalorder %s1484_s0, %s1484_s0 }
  0x29   :  { %p1491_p4 = por %p1490_p3, %p1489_p2 }
  0x2b   :  { %p1492_p5 = pnand %p1491_p4, %p1485_p1 }
  0x2d   :  { %1495 = shalt.err (!%p1492_p5)
}
  0x2e   :  { %67 = dma.hbm_to_vmem [thread:$0]  %s1633_s5, 1024, %s62_s1, [#allocation10], %s1525_s27, %s1525_s27, %s1526_s28  }
  0x2f   :  { %1516 = dma.done.wait [#allocation4], 1024  }
  0x30   :  { %1517 = vsyncadd [#allocation4], 4294966272 }
  0x31   :  { %1518 = dma.done.wait [#allocation7], 9216  }
  0x32   :  { %1519 = vsyncadd [#allocation7], 4294958080 }
  0x33   :  { %1520 = dma.done.wait [#allocation10], 1024  }
  0x34   :  { %1521 = vsyncadd [#allocation10], 4294966272  ;;  %v1336_v0 = vld [vmem:[#allocation6 + $0x78] sm:$0xff]   ;;  %v1340_v4 = vld [vmem:[#allocation6 + $0x70] sm:$0xff]   ;;  %vm1533_vm0 = vmmov 0  }
  0x35   :  { %v1337_v1 = vld [vmem:[#allocation6 + $0xf8] sm:$0xff]   ;;  %1177 = vmatprep.subr.bf16.mxu0 %v1336_v0  ;;  %v1341_v5 = vld [vmem:[#allocation6 + $0xf0] sm:$0xff]   ;;  %v1344_v8 = vld [vmem:[#allocation6 + $0x68] sm:$0xff]  }
  0x36   :  { %v1338_v2 = vld [vmem:[#allocation6 + $0x38] sm:$0xff]   ;;  %1199 = vmatprep.subr.bf16.mxu1 %v1337_v1  ;;  %v1342_v6 = vld [vmem:[#allocation6 + $0x30] sm:$0xff]   ;;  %v1345_v9 = vld [vmem:[#allocation6 + $0xe8] sm:$0xff]  }
  0x37   :  { %v1339_v3 = vld [vmem:[#allocation6 + $0xb8] sm:$0xff]   ;;  %1178 = vmatpush3.bf16.msra.mxu0 %v1338_v2  ;;  %v1343_v7 = vld [vmem:[#allocation6 + $0xb0] sm:$0xff]   ;;  %v1346_v10 = vld [vmem:[#allocation6 + $0x28] sm:$0xff]  }
  0x38   :  { %1200 = vmatpush3.bf16.msra.mxu1 %v1339_v3  ;;  %1179 = vmatprep.subr.bf16.mxu0 %v1340_v4  ;;  %v1347_v11 = vld [vmem:[#allocation6 + $0xa8] sm:$0xff]   ;;  %v1348_v12 = vld [vmem:[#allocation6 + $0x60] sm:$0xff]   ;;  %v1352_v16 = vld [vmem:[#allocation6 + $0x58] sm:$0xff]  }
  0x39   :  { %1201 = vmatprep.subr.bf16.mxu1 %v1341_v5  ;;  %v1349_v13 = vld [vmem:[#allocation6 + $0xe0] sm:$0xff]   ;;  %v1353_v17 = vld [vmem:[#allocation6 + $0xd8] sm:$0xff]   ;;  %v1356_v20 = vld [vmem:[#allocation6 + $0x50] sm:$0xff]  }
  0x3a   :  { %v1350_v14 = vld [vmem:[#allocation6 + $0x20] sm:$0xff]   ;;  %v1354_v18 = vld [vmem:[#allocation6 + $0x18] sm:$0xff]   ;;  %v1357_v21 = vld [vmem:[#allocation6 + $0xd0] sm:$0xff]  }
  0x3b   :  { %1180 = vmatpush3.bf16.msra.mxu0 %v1342_v6  ;;  %v1351_v15 = vld [vmem:[#allocation6 + $0xa0] sm:$0xff]   ;;  %v1355_v19 = vld [vmem:[#allocation6 + $0x98] sm:$0xff]   ;;  %v1358_v22 = vld [vmem:[#allocation6 + $0x10] sm:$0xff]  }
  0x3c   :  { %1202 = vmatpush3.bf16.msra.mxu1 %v1343_v7  ;;  %1181 = vmatprep.subr.bf16.mxu0 %v1344_v8  ;;  %v1359_v23 = vld [vmem:[#allocation6 + $0x90] sm:$0xff]   ;;  %v1360_v24 = vld [vmem:[#allocation6 + $0x48] sm:$0xff]   ;;  %v1364_v28 = vld [vmem:[#allocation6 + $0x40] sm:$0xff]  }
  0x3d   :  { %1203 = vmatprep.subr.bf16.mxu1 %v1345_v9  ;;  %v1361_v25 = vld [vmem:[#allocation6 + $0xc8] sm:$0xff]   ;;  %v1365_v29 = vld [vmem:[#allocation6 + $0xc0] sm:$0xff]   ;;  %v1368_v40 = vld [vmem:[#allocation6 + $0x178] sm:$0xff]  }
  0x3e   :  { %v1362_v26 = vld [vmem:[#allocation6 + $0x8] sm:$0xff]   ;;  %v1366_v30 = vld [vmem:[#allocation6] sm:$0xff]   ;;  %v1369_v41 = vld [vmem:[#allocation6 + $0x1f8] sm:$0xff]  }
  0x3f   :  { %1182 = vmatpush3.bf16.msra.mxu0 %v1346_v10  ;;  %v1363_v27 = vld [vmem:[#allocation6 + $0x88] sm:$0xff]   ;;  %v1367_v31 = vld [vmem:[#allocation6 + $0x80] sm:$0xff]   ;;  %v1370_v42 = vld [vmem:[#allocation6 + $0x138] sm:$0xff]  }
  0x40   :  { %1204 = vmatpush3.bf16.msra.mxu1 %v1347_v11  ;;  %1183 = vmatprep.subr.bf16.mxu0 %v1348_v12  ;;  %v91_v32 = vld [vmem:[#allocation3] sm:$0xff]  ;;  %v92_v34 = vld [vmem:[#allocation3 + $0x8] sm:$0xff]  ;;  %v1371_v43 = vld [vmem:[#allocation6 + $0x1b8] sm:$0xff]  }
  0x41   :  { %1205 = vmatprep.subr.bf16.mxu1 %v1349_v13  ;;  %v95_v33 = vld [vmem:[#allocation3 + $0x20] sm:$0xff]  ;;  %v96_v37 = vld [vmem:[#allocation3 + $0x28] sm:$0xff]  ;;  %v1372_v44 = vld [vmem:[#allocation6 + $0x170] sm:$0xff]  }
  0x42   :  { %v1086_v35 = vcombine.low %v91_v32, %v95_v33  ;;  %v1087_v36 = vcombine.high %v91_v32, %v95_v33  ;;  %v1088_v38 = vcombine.low %v92_v34, %v96_v37  ;;  %v1089_v39 = vcombine.high %v92_v34, %v96_v37  ;;  %v1373_v45 = vld [vmem:[#allocation6 + $0x1f0] sm:$0xff]   ;;  %v1376_v48 = vld [vmem:[#allocation6 + $0x168] sm:$0xff]   ;;  %v1380_v52 = vld [vmem:[#allocation6 + $0x160] sm:$0xff]  }
  0x43   :  { %1184 = vmatpush3.bf16.msra.mxu0 %v1350_v14  ;;  %v1374_v46 = vld [vmem:[#allocation6 + $0x130] sm:$0xff]   ;;  %v1377_v49 = vld [vmem:[#allocation6 + $0x1e8] sm:$0xff]   ;;  %v1381_v53 = vld [vmem:[#allocation6 + $0x1e0] sm:$0xff]  }
  0x44   :  { %1206 = vmatpush3.bf16.msra.mxu1 %v1351_v15  ;;  %1185 = vmatprep.subr.bf16.mxu0 %v1352_v16  ;;  %v1375_v47 = vld [vmem:[#allocation6 + $0x1b0] sm:$0xff]   ;;  %v1378_v50 = vld [vmem:[#allocation6 + $0x128] sm:$0xff]   ;;  %v1382_v54 = vld [vmem:[#allocation6 + $0x120] sm:$0xff]  }
  0x45   :  { %1207 = vmatprep.subr.bf16.mxu1 %v1353_v17  ;;  %683 = vmatprep.mubr.bf16.mxu0 %v1087_v36  ;;  %v1379_v51 = vld [vmem:[#allocation6 + $0x1a8] sm:$0xff]   ;;  %v1383_v55 = vld [vmem:[#allocation6 + $0x1a0] sm:$0xff]   ;;  %v1384_v56 = vld [vmem:[#allocation6 + $0x158] sm:$0xff]   ;;  %v1532_v17 = vmov 0.0  }
  0x46   :  { %724 = vmatprep.mubr.bf16.mxu1 %v1089_v39  ;;  %v1385_v57 = vld [vmem:[#allocation6 + $0x1d8] sm:$0xff]   ;;  %v1388_v60 = vld [vmem:[#allocation6 + $0x150] sm:$0xff]   ;;  %v1392_v0 = vld [vmem:[#allocation6 + $0x148] sm:$0xff]  }
  0x47   :  { %1186 = vmatpush3.bf16.msra.mxu0 %v1354_v18  ;;  %v1386_v58 = vld [vmem:[#allocation6 + $0x118] sm:$0xff]   ;;  %v1389_v61 = vld [vmem:[#allocation6 + $0x1d0] sm:$0xff]   ;;  %v1393_v1 = vld [vmem:[#allocation6 + $0x1c8] sm:$0xff]  }
  0x48   :  { %1208 = vmatpush3.bf16.msra.mxu1 %v1355_v19  ;;  %1187 = vmatprep.subr.bf16.mxu0 %v1356_v20  ;;  %v1387_v59 = vld [vmem:[#allocation6 + $0x198] sm:$0xff]   ;;  %v1390_v62 = vld [vmem:[#allocation6 + $0x110] sm:$0xff]   ;;  %v1394_v2 = vld [vmem:[#allocation6 + $0x108] sm:$0xff]  }
  0x49   :  { %1209 = vmatprep.subr.bf16.mxu1 %v1357_v21  ;;  %v1391_v63 = vld [vmem:[#allocation6 + $0x190] sm:$0xff]   ;;  %v1395_v3 = vld [vmem:[#allocation6 + $0x188] sm:$0xff]   ;;  %v1396_v4 = vld [vmem:[#allocation6 + $0x140] sm:$0xff]  }
  0x4a   :  { %v1397_v5 = vld [vmem:[#allocation6 + $0x1c0] sm:$0xff]   ;;  %v93_v8 = vld [vmem:[#allocation3 + $0x10] sm:$0xff]  ;;  %v94_v12 = vld [vmem:[#allocation3 + $0x18] sm:$0xff] }
  0x4b   :  { %1188 = vmatpush3.bf16.msra.mxu0 %v1358_v22  ;;  %v1398_v6 = vld [vmem:[#allocation6 + $0x100] sm:$0xff]   ;;  %v97_v9 = vld [vmem:[#allocation3 + $0x30] sm:$0xff]  ;;  %v98_v13 = vld [vmem:[#allocation3 + $0x38] sm:$0xff] }
  0x4c   :  { %1210 = vmatpush3.bf16.msra.mxu1 %v1359_v23  ;;  %1189 = vmatprep.subr.bf16.mxu0 %v1360_v24  ;;  %v1399_v7 = vld [vmem:[#allocation6 + $0x180] sm:$0xff]   ;;  %v1090_v10 = vcombine.low %v93_v8, %v97_v9  ;;  %v1091_v11 = vcombine.high %v93_v8, %v97_v9  ;;  %v1092_v14 = vcombine.low %v94_v12, %v98_v13  ;;  %v1400_v16 = vld [vmem:[#allocation8 + $0x38] sm:$0xff]   ;;  %v1401_v18 = vld [vmem:[#allocation8 + $0x30] sm:$0xff]  }
  0x4d   :  { %1211 = vmatprep.subr.bf16.mxu1 %v1361_v25  ;;  %v1093_v15 = vcombine.high %v94_v12, %v98_v13  ;;  %v1402_v19 = vld [vmem:[#allocation8 + $0x28] sm:$0xff]   ;;  %v1403_v20 = vld [vmem:[#allocation8 + $0x20] sm:$0xff]   ;;  %v1404_v21 = vld [vmem:[#allocation8 + $0x18] sm:$0xff]  }
  0x4e   :  { %v1405_v22 = vld [vmem:[#allocation8 + $0x10] sm:$0xff]   ;;  %v1406_v23 = vld [vmem:[#allocation8 + $0x8] sm:$0xff]   ;;  %v1407_v24 = vld [vmem:[#allocation8] sm:$0xff]  }
  0x4f   :  { %1190 = vmatpush3.bf16.msra.mxu0 %v1362_v26  ;;  %v1408_v25 = vld [vmem:[#allocation9 + $0x38] sm:$0xff]   ;;  %v1409_v26 = vld [vmem:[#allocation9 + $0x30] sm:$0xff]  }
  0x50   :  { %1212 = vmatpush3.bf16.msra.mxu1 %v1363_v27  ;;  %1191 = vmatprep.subr.bf16.mxu0 %v1364_v28  ;;  %v1410_v27 = vld [vmem:[#allocation9 + $0x28] sm:$0xff]   ;;  %v1411_v28 = vld [vmem:[#allocation9 + $0x20] sm:$0xff]  }
  0x51   :  { %1213 = vmatprep.subr.bf16.mxu1 %v1365_v29  ;;  %v1412_v29 = vld [vmem:[#allocation9 + $0x18] sm:$0xff]  }
  0x53   :  { %1192 = vmatpush3.bf16.msra.mxu0 %v1366_v30 }
  0x54   :  { %1214 = vmatpush3.bf16.msra.mxu1 %v1367_v31  ;;  %1221 = vmatprep.subr.bf16.mxu0 %v1368_v40 }
  0x55   :  { %1243 = vmatprep.subr.bf16.mxu1 %v1369_v41 }
  0x56   :  { %684 = vmatmul.mubr.bf16.vlgmr.msra.gmra.mxu0 %v1086_v35 }
  0x57   :  { %725 = vmatmul.mubr.bf16.vlgmr.msra.gmra.mxu1 %v1088_v38  ;;  %1222 = vmatpush3.bf16.msra.mxu0 %v1370_v42 }
  0x58   :  { %1244 = vmatpush3.bf16.msra.mxu1 %v1371_v43  ;;  %1223 = vmatprep.subr.bf16.mxu0 %v1372_v44 }
  0x59   :  { %1245 = vmatprep.subr.bf16.mxu1 %v1373_v45  ;;  %765 = vmatprep.mubr.bf16.mxu0 %v1091_v11 }
  0x5a   :  { %806 = vmatprep.mubr.bf16.mxu1 %v1093_v15  ;;  %v1168_v15 = vld [vmem:[%s1634_s6] ss:$0 sm:$0xff] }
  0x5b   :  { %1224 = vmatpush3.bf16.msra.mxu0 %v1374_v46 }
  0x5c   :  { %1246 = vmatpush3.bf16.msra.mxu1 %v1375_v47  ;;  %1225 = vmatprep.subr.bf16.mxu0 %v1376_v48 }
  0x5d   :  { %1247 = vmatprep.subr.bf16.mxu1 %v1377_v49 }
  0x5f   :  { %1226 = vmatpush3.bf16.msra.mxu0 %v1378_v50 }
  0x60   :  { %1248 = vmatpush3.bf16.msra.mxu1 %v1379_v51  ;;  %1227 = vmatprep.subr.bf16.mxu0 %v1380_v52 }
  0x61   :  { %1249 = vmatprep.subr.bf16.mxu1 %v1381_v53 }
  0x63   :  { %1228 = vmatpush3.bf16.msra.mxu0 %v1382_v54 }
  0x64   :  { %1250 = vmatpush3.bf16.msra.mxu1 %v1383_v55  ;;  %1229 = vmatprep.subr.bf16.mxu0 %v1384_v56 }
  0x65   :  { %1251 = vmatprep.subr.bf16.mxu1 %v1385_v57 }
  0x67   :  { %1230 = vmatpush3.bf16.msra.mxu0 %v1386_v58 }
  0x68   :  { %1252 = vmatpush3.bf16.msra.mxu1 %v1387_v59  ;;  %1231 = vmatprep.subr.bf16.mxu0 %v1388_v60  ;;  %v1158_v59 = vld [vmem:[%s1630_s2] ss:$0 sm:$0xff] }
  0x69   :  { %1253 = vmatprep.subr.bf16.mxu1 %v1389_v61 }
  0x6b   :  { %1232 = vmatpush3.bf16.msra.mxu0 %v1390_v62 }
  0x6c   :  { %1254 = vmatpush3.bf16.msra.mxu1 %v1391_v63  ;;  %1233 = vmatprep.subr.bf16.mxu0 %v1392_v0  ;;  %v1413_v0 = vld [vmem:[#allocation9 + $0x10] sm:$0xff]  }
  0x6d   :  { %1255 = vmatprep.subr.bf16.mxu1 %v1393_v1  ;;  %v1414_v1 = vld [vmem:[#allocation9 + $0x8] sm:$0xff]  }
  0x6f   :  { %1234 = vmatpush3.bf16.msra.mxu0 %v1394_v2  ;;  %v1415_v2 = vld [vmem:[#allocation9] sm:$0xff]  }
  0x70   :  { %1256 = vmatpush3.bf16.msra.mxu1 %v1395_v3  ;;  %1235 = vmatprep.subr.bf16.mxu0 %v1396_v4  ;;  %v1159_v3 = vld [vmem:[%s1631_s3] ss:$0 sm:$0xff]  ;;  %s1534_s3 = smov [#allocation11]  }
  0x71   :  { %1257 = vmatprep.subr.bf16.mxu1 %v1397_v5  ;;  %s1072_s26 = sshll.u32 %s1534_s3, 4  ;;  %s1073_s26 = int_to_ptr.vmem [resolvable:$true] %s1072_s26 }
  0x72   :  { %s1496_s27 = scalar_lea.vmem %s1073_s26, 256  ;;  %p1501_p7 = scmp.lt.s32.totalorder %s1073_s26, %s1073_s26 }
  0x73   :  { %1236 = vmatpush3.bf16.msra.mxu0 %v1398_v6  ;;  %p1497_p6 = scmp.ne.s32.totalorder %s1073_s26, %s1496_s27  ;;  %p1502_p8 = scmp.lt.s32.totalorder %s1496_s27, %s1496_s27 }
  0x74   :  { %1258 = vmatpush3.bf16.msra.mxu1 %v1399_v7  ;;  %1283 = vmatprep.subr.bf16.mxu0 %v1532_v17 }
  0x75   :  { %1303 = vmatprep.subr.bf16.mxu1 %v1532_v17  ;;  %p1503_p9 = por %p1502_p8, %p1501_p7 }
  0x76   :  { %766 = vmatmul.mubr.bf16.vlgmr.msra.gmra.mxu0 %v1090_v10 }
  0x77   :  { %807 = vmatmul.mubr.bf16.vlgmr.msra.gmra.mxu1 %v1092_v14  ;;  %1284 = vmatpush3.bf16.msra.mxu0 %v1400_v16  ;;  %p1504_p10 = pnand %p1503_p9, %p1497_p6 }
  0x78   :  { %1285 = vmatprep.subr.bf16.mxu0 %v1532_v17  ;;  %1299 = vmatprep.mubr.msk.bf16.mxu0 %vm1533_vm0, %v1532_v17 }
  0x79   :  { %1319 = vmatprep.mubr.msk.bf16.mxu1 %vm1533_vm0, %v1532_v17  ;;  %1304 = vmatpush3.bf16.msra.mxu1 %v1408_v25 }
  0x7a   :  { %1305 = vmatprep.subr.bf16.mxu1 %v1532_v17 }
  0x7b   :  { %1286 = vmatpush3.bf16.msra.mxu0 %v1401_v18 }
  0x7c   :  { %1287 = vmatprep.subr.bf16.mxu0 %v1532_v17 }
  0x7d   :  { %1306 = vmatpush3.bf16.msra.mxu1 %v1409_v26 }
  0x7e   :  { %1307 = vmatprep.subr.bf16.mxu1 %v1532_v17 }
  0x7f   :  { %1288 = vmatpush3.bf16.msra.mxu0 %v1402_v19 }
  0x80   :  { %1289 = vmatprep.subr.bf16.mxu0 %v1532_v17 }
  0x81   :  { %1308 = vmatpush3.bf16.msra.mxu1 %v1410_v27 }
  0x82   :  { %1309 = vmatprep.subr.bf16.mxu1 %v1532_v17 }
  0x83   :  { %1290 = vmatpush3.bf16.msra.mxu0 %v1403_v20 }
  0x84   :  { %1291 = vmatprep.subr.bf16.mxu0 %v1532_v17 }
  0x85   :  { %1310 = vmatpush3.bf16.msra.mxu1 %v1411_v28 }
  0x86   :  { %1311 = vmatprep.subr.bf16.mxu1 %v1532_v17 }
  0x87   :  { %1292 = vmatpush3.bf16.msra.mxu0 %v1404_v21 }
  0x88   :  { %1293 = vmatprep.subr.bf16.mxu0 %v1532_v17 }
  0x89   :  { %1312 = vmatpush3.bf16.msra.mxu1 %v1412_v29 }
  0x8a   :  { %1313 = vmatprep.subr.bf16.mxu1 %v1532_v17 }
  0x8b   :  { %1294 = vmatpush3.bf16.msra.mxu0 %v1405_v22 }
  0x8c   :  { %1295 = vmatprep.subr.bf16.mxu0 %v1532_v17 }
  0x8d   :  { %1314 = vmatpush3.bf16.msra.mxu1 %v1413_v0 }
  0x8e   :  { %1315 = vmatprep.subr.bf16.mxu1 %v1532_v17 }
  0x8f   :  { %1296 = vmatpush3.bf16.msra.mxu0 %v1406_v23 }
  0x90   :  { %1297 = vmatprep.subr.bf16.mxu0 %v1532_v17 }
  0x91   :  { %1316 = vmatpush3.bf16.msra.mxu1 %v1414_v1 }
  0x92   :  { %1317 = vmatprep.subr.bf16.mxu1 %v1532_v17 }
  0x93   :  { %1298 = vmatpush3.bf16.msra.mxu0 %v1407_v24 }
  0x95   :  { %1318 = vmatpush3.bf16.msra.mxu1 %v1415_v2 }
 0x116   :  { %v1193_v30 = vpop.f32.mrf.mxu0 }
 0x117   :  { %v1215_v31 = vpop.f32.mrf.mxu1 }
 0x118   :  { %v1194_v32 = vpop.f32.mrf.mxu0 }
 0x119   :  { %v1216_v33 = vpop.f32.mrf.mxu1  ;;  %v1195_v37 = vadd.f32 %v1194_v32, %v1193_v30 }
 0x11a   :  { %v1196_v34 = vpop.f32.mrf.mxu0  ;;  %v1217_v38 = vadd.f32 %v1216_v33, %v1215_v31 }
 0x11b   :  { %v1218_v35 = vpop.f32.mrf.mxu1 }
 0x11c   :  { %v1197_v36 = vpop.f32.mrf.mxu0  ;;  %v727_v43 = vadd.f32 %v1217_v38, %v1195_v37 }
 0x11d   :  { %v1219_v39 = vpop.f32.mrf.mxu1  ;;  %v1198_v44 = vadd.f32 %v1197_v36, %v1196_v34 }
 0x11e   :  { %v1220_v45 = vadd.f32 %v1219_v39, %v1218_v35 }
 0x120   :  { %v730_v52 = vadd.f32 %v1220_v45, %v1198_v44 }
 0x136   :  { %v1237_v40 = vpop.f32.mrf.mxu0 }
 0x137   :  { %v1259_v41 = vpop.f32.mrf.mxu1 }
 0x138   :  { %v1238_v42 = vpop.f32.mrf.mxu0 }
 0x139   :  { %v1239_v46 = vadd.f32 %v1238_v42, %v1237_v40  ;;  %v1260_v47 = vpop.f32.mrf.mxu1 }
 0x13a   :  { %v1240_v48 = vpop.f32.mrf.mxu0  ;;  %v1261_v53 = vadd.f32 %v1260_v47, %v1259_v41 }
 0x13b   :  { %v768_v49 = vadd.f32 %v1239_v46, %v727_v43  ;;  %v1262_v50 = vpop.f32.mrf.mxu1 }
 0x13c   :  { %v1241_v51 = vpop.f32.mrf.mxu0 }
 0x13d   :  { %v1242_v54 = vadd.f32 %v1241_v51, %v1240_v48  ;;  %v1263_v55 = vpop.f32.mrf.mxu1  ;;  %v809_v56 = vadd.f32 %v1261_v53, %v768_v49 }
 0x13e   :  { %v1264_v58 = vadd.f32 %v1263_v55, %v1262_v50 }
 0x13f   :  { %v771_v57 = vadd.f32 %v1242_v54, %v730_v52  ;;  %v831_v61 = vadd.f32 %v1158_v59, %v809_v56 }
 0x141   :  { %v812_v60 = vadd.f32 %v1264_v58, %v771_v57 }
 0x143   :  { %v832_v62 = vadd.f32 %v1158_v59, %v812_v60 }
 0x145   :  { %v833_v63 = vpack.c.bf16 %v832_v62, %v831_v61 }
 0x147   :  { %1300 = vmatmul.mubr.bf16.vlgmr.msra.gmra.mxu0 %v833_v63 }
 0x207   :  { %v939_v4 = vpop.f32.mrf.mxu0 }
 0x208   :  { %v940_v5 = vadd.f32 %v1159_v3, %v939_v4 }
 0x209   :  { %v1301_v6 = vpop.f32.mrf.mxu0 }
 0x20a   :  { %v948_v8 = vmul.f32 0.2, %v940_v5  ;;  %vm946_vm1 = vcmp.ge.f32.partialorder %v940_v5, 0.0 }
 0x20b   :  { %v942_v7 = vpop.f32.mrf.mxu0 }
 0x20c   :  { %v943_v9 = vadd.f32 %v1159_v3, %v942_v7  ;;  %v950_v12 = vsel %vm946_vm1, %v940_v5, %v948_v8 }
 0x20d   :  { %v1302_v10 = vpop.f32.mrf.mxu0 }
 0x20e   :  { %vm947_vm2 = vcmp.ge.f32.partialorder %v943_v9, 0.0  ;;  %v949_v11 = vmul.f32 0.2, %v943_v9 }
 0x210   :  { %v951_v13 = vsel %vm947_vm2, %v943_v9, %v949_v11 }
 0x211   :  { %v952_v14 = vpack.c.bf16 %v951_v13, %v950_v12 }
 0x213   :  { %1320 = vmatmul.mubr.bf16.vlgmr.msra.gmra.mxu1 %v952_v14 }
 0x2d3   :  { %v1058_v16 = vpop.f32.mrf.mxu1 }
 0x2d4   :  { %v1059_v17 = vadd.f32 %v1168_v15, %v1058_v16 }
 0x2d5   :  { %v1321_v18 = vpop.f32.mrf.mxu1 }
 0x2d6   :  { %1065 = vst [vmem:[#allocation11] sm:$0xff] %v1059_v17 }
 0x2d7   :  { %v1061_v19 = vpop.f32.mrf.mxu1 }
 0x2d8   :  { %v1062_v20 = vadd.f32 %v1168_v15, %v1061_v19 }
 0x2d9   :  { %v1322_v21 = vpop.f32.mrf.mxu1 }
 0x2da   :  { %1066 = vst [vmem:[#allocation11 + $0x8] sm:$0xff] %v1062_v20 }
 0x2db   :  { %1507 = shalt.err (!%p1504_p10)
}
 0x2dc   :  { %s1535_s28 = smov 128   ;;  %s1536_s6 = smov 8  }
 0x2dd   :  { %1078 = dma.vmem_to_hbm [thread:$0]  %s1073_s26, 256, %s1635_s7, [#allocation5], %s1535_s28, %s1535_s28, %s1536_s6  }
 0x2de   :  { %1522 = dma.done.wait [#allocation5], 256  }
 0x2df   :  { %1523 = vsyncadd [#allocation5], 4294967040 }
 0x2e0   :  { %1082 = vsyncpa [#allocation4], 1 }
 0x2e1   :  { %1083 = vsyncpa [#allocation7], 1 }
 0x2e2   :  { %1084 = vsyncpa [#allocation10], 1 }
 0x2e3   :  { %1085 = vsyncpa [#allocation5], 1 }

// kernel: tpu_custom_call.1
= control target key start
LH: loop header
LB: loop body
LE: loop exit
PB: predicated region body
PF: predicated region fallthrough
CT: control target
= control target key end

     0   :  { %12 = vsyncpa [#allocation4], 0  ;;  %s1628_s0 = inlined_call_operand.hbm [shape: bf16[16,1024], index: 0, kind: input, shape index: {}]   ;;  %s1629_s1 = inlined_call_operand.hbm [shape: bf16[1024,128], index: 1, kind: input, shape index: {}]   ;;  %s1630_s2 = inlined_call_operand.vmem [shape: f32[1,128], index: 2, kind: input, shape index: {}]   ;;  %s1631_s3 = inlined_call_operand.vmem [shape: f32[1,128], index: 3, kind: input, shape index: {}]   ;;  %s1632_s4 = inlined_call_operand.hbm [shape: bf16[128,128], index: 4, kind: input, shape index: {}]   ;;  %s1633_s5 = inlined_call_operand.hbm [shape: bf16[128,128], index: 5, kind: input, shape index: {}]   ;;  %s1634_s6 = inlined_call_operand.vmem [shape: f32[1,128], index: 6, kind: input, shape index: {}]   ;;  %s1635_s7 = inlined_call_operand.hbm [shape: f32[16,128], index: 7, kind: output, shape index: {}]  }
   0x1   :  { %13 = vsyncpa [#allocation7], 0 }
   0x2   :  { %14 = vsyncpa [#allocation10], 0 }
   0x3   :  { %15 = vsyncpa [#allocation5], 0  ;;  %s1524_s24 = smov [#allocation6]  }
   0x4   :  { %s33_s25 = sshll.u32 %s1524_s24, 4  ;;  %s34_s25 = int_to_ptr.vmem [resolvable:$true] %s33_s25 }
   0x5   :  { %s1424_s26 = scalar_lea.vmem %s34_s25, 8192  ;;  %p1429_p1 = scmp.lt.s32.totalorder %s34_s25, %s34_s25 }
   0x6   :  { %p1425_p0 = scmp.ne.s32.totalorder %s34_s25, %s1424_s26  ;;  %p1430_p2 = scmp.lt.s32.totalorder %s1424_s26, %s1424_s26 }
   0x8   :  { %p1431_p3 = por %p1430_p2, %p1429_p1 }
   0xa   :  { %p1432_p4 = pnand %p1431_p3, %p1425_p0 }
   0xc   :  { %1435 = shalt.err (!%p1432_p4)
}
   0xd   :  { %s1525_s27 = smov 64   ;;  %s1526_s28 = smov 4  }
   0xe   :  { %39 = dma.hbm_to_vmem [thread:$0]  %s1629_s1, 8192, %s34_s25, [#allocation7], %s1525_s27, %s1525_s27, %s1526_s28  }
   0xf   :  { %s1527_s8 = smov [#allocation3]  }
  0x10   :  { %s21_s9 = sshll.u32 %s1527_s8, 4  ;;  %s22_s9 = int_to_ptr.vmem [resolvable:$true] %s21_s9 }
  0x11   :  { %s1444_s10 = scalar_lea.vmem %s22_s9, 1024  ;;  %p1449_p6 = scmp.lt.s32.totalorder %s22_s9, %s22_s9 }
  0x12   :  { %p1445_p5 = scmp.ne.s32.totalorder %s22_s9, %s1444_s10  ;;  %p1450_p7 = scmp.lt.s32.totalorder %s1444_s10, %s1444_s10 }
  0x14   :  { %p1451_p8 = por %p1450_p7, %p1449_p6 }
  0x16   :  { %p1452_p9 = pnand %p1451_p8, %p1445_p5 }
  0x18   :  { %1455 = shalt.err (!%p1452_p9)
}
  0x19   :  { %s1528_s11 = smov 512   ;;  %s1529_s12 = smov 32  }
  0x1a   :  { %27 = dma.hbm_to_vmem [thread:$0]  %s1628_s0, 1024, %s22_s9, [#allocation4], %s1528_s11, %s1528_s11, %s1529_s12  }
  0x1b   :  { %s1530_s15 = smov [#allocation8]   ;;  %s1531_s17 = smov [#allocation9]  }
  0x1c   :  { %s49_s16 = sshll.u32 %s1530_s15, 4  ;;  %s61_s1 = sshll.u32 %s1531_s17, 4  ;;  %s50_s16 = int_to_ptr.vmem [resolvable:$true] %s49_s16  ;;  %s62_s1 = int_to_ptr.vmem [resolvable:$true] %s61_s1 }
  0x1d   :  { %s1464_s18 = scalar_lea.vmem %s50_s16, 1024  ;;  %p1469_p11 = scmp.lt.s32.totalorder %s50_s16, %s50_s16 }
  0x1e   :  { %p1465_p10 = scmp.ne.s32.totalorder %s50_s16, %s1464_s18  ;;  %p1470_p12 = scmp.lt.s32.totalorder %s1464_s18, %s1464_s18 }
  0x20   :  { %p1471_p13 = por %p1470_p12, %p1469_p11 }
  0x22   :  { %p1472_p0 = pnand %p1471_p13, %p1465_p10 }
  0x24   :  { %1475 = shalt.err (!%p1472_p0)
}
  0x25   :  { %55 = dma.hbm_to_vmem [thread:$0]  %s1632_s4, 1024, %s50_s16, [#allocation7], %s1525_s27, %s1525_s27, %s1526_s28  }
  0x26   :  { %s1484_s0 = scalar_lea.vmem %s62_s1, 1024  ;;  %p1489_p2 = scmp.lt.s32.totalorder %s62_s1, %s62_s1 }
  0x27   :  { %p1485_p1 = scmp.ne.s32.totalorder %s62_s1, %s1484_s0  ;;  %p1490_p3 = scmp.lt.s32.totalorder %s1484_s0, %s1484_s0 }
  0x29   :  { %p1491_p4 = por %p1490_p3, %p1489_p2 }
  0x2b   :  { %p1492_p5 = pnand %p1491_p4, %p1485_p1 }
  0x2d   :  { %1495 = shalt.err (!%p1492_p5)
}
  0x2e   :  { %67 = dma.hbm_to_vmem [thread:$0]  %s1633_s5, 1024, %s62_s1, [#allocation10], %s1525_s27, %s1525_s27, %s1526_s28  }
  0x2f   :  { %1516 = dma.done.wait [#allocation4], 1024  }
  0x30   :  { %1517 = vsyncadd [#allocation4], 4294966272 }
  0x31   :  { %1518 = dma.done.wait [#allocation7], 9216  }
  0x32   :  { %1519 = vsyncadd [#allocation7], 4294958080 }
  0x33   :  { %1520 = dma.done.wait [#allocation10], 1024  }
  0x34   :  { %1521 = vsyncadd [#allocation10], 4294966272  ;;  %v1336_v0 = vld [vmem:[#allocation6 + $0x78] sm:$0xff]   ;;  %v1340_v4 = vld [vmem:[#allocation6 + $0x70] sm:$0xff]   ;;  %vm1533_vm0 = vmmov 0  }
  0x35   :  { %v1337_v1 = vld [vmem:[#allocation6 + $0xf8] sm:$0xff]   ;;  %1177 = vmatprep.subr.bf16.mxu0 %v1336_v0  ;;  %v1341_v5 = vld [vmem:[#allocation6 + $0xf0] sm:$0xff]   ;;  %v1344_v8 = vld [vmem:[#allocation6 + $0x68] sm:$0xff]  }
  0x36   :  { %v1338_v2 = vld [vmem:[#allocation6 + $0x38] sm:$0xff]   ;;  %1199 = vmatprep.subr.bf16.mxu1 %v1337_v1  ;;  %v1342_v6 = vld [vmem:[#allocation6 + $0x30] sm:$0xff]   ;;  %v1345_v9 = vld [vmem:[#allocation6 + $0xe8] sm:$0xff]  }
  0x37   :  { %v1339_v3 = vld [vmem:[#allocation6 + $0xb8] sm:$0xff]   ;;  %1178 = vmatpush3.bf16.msra.mxu0 %v1338_v2  ;;  %v1343_v7 = vld [vmem:[#allocation6 + $0xb0] sm:$0xff]   ;;  %v1346_v10 = vld [vmem:[#allocation6 + $0x28] sm:$0xff]  }
  0x38   :  { %1200 = vmatpush3.bf16.msra.mxu1 %v1339_v3  ;;  %1179 = vmatprep.subr.bf16.mxu0 %v1340_v4  ;;  %v1347_v11 = vld [vmem:[#allocation6 + $0xa8] sm:$0xff]   ;;  %v1348_v12 = vld [vmem:[#allocation6 + $0x60] sm:$0xff]   ;;  %v1352_v16 = vld [vmem:[#allocation6 + $0x58] sm:$0xff]  }
  0x39   :  { %1201 = vmatprep.subr.bf16.mxu1 %v1341_v5  ;;  %v1349_v13 = vld [vmem:[#allocation6 + $0xe0] sm:$0xff]   ;;  %v1353_v17 = vld [vmem:[#allocation6 + $0xd8] sm:$0xff]   ;;  %v1356_v20 = vld [vmem:[#allocation6 + $0x50] sm:$0xff]  }
  0x3a   :  { %v1350_v14 = vld [vmem:[#allocation6 + $0x20] sm:$0xff]   ;;  %v1354_v18 = vld [vmem:[#allocation6 + $0x18] sm:$0xff]   ;;  %v1357_v21 = vld [vmem:[#allocation6 + $0xd0] sm:$0xff]  }
  0x3b   :  { %1180 = vmatpush3.bf16.msra.mxu0 %v1342_v6  ;;  %v1351_v15 = vld [vmem:[#allocation6 + $0xa0] sm:$0xff]   ;;  %v1355_v19 = vld [vmem:[#allocation6 + $0x98] sm:$0xff]   ;;  %v1358_v22 = vld [vmem:[#allocation6 + $0x10] sm:$0xff]  }
  0x3c   :  { %1202 = vmatpush3.bf16.msra.mxu1 %v1343_v7  ;;  %1181 = vmatprep.subr.bf16.mxu0 %v1344_v8  ;;  %v1359_v23 = vld [vmem:[#allocation6 + $0x90] sm:$0xff]   ;;  %v1360_v24 = vld [vmem:[#allocation6 + $0x48] sm:$0xff]   ;;  %v1364_v28 = vld [vmem:[#allocation6 + $0x40] sm:$0xff]  }
  0x3d   :  { %1203 = vmatprep.subr.bf16.mxu1 %v1345_v9  ;;  %v1361_v25 = vld [vmem:[#allocation6 + $0xc8] sm:$0xff]   ;;  %v1365_v29 = vld [vmem:[#allocation6 + $0xc0] sm:$0xff]   ;;  %v1368_v40 = vld [vmem:[#allocation6 + $0x178] sm:$0xff]  }
  0x3e   :  { %v1362_v26 = vld [vmem:[#allocation6 + $0x8] sm:$0xff]   ;;  %v1366_v30 = vld [vmem:[#allocation6] sm:$0xff]   ;;  %v1369_v41 = vld [vmem:[#allocation6 + $0x1f8] sm:$0xff]  }
  0x3f   :  { %1182 = vmatpush3.bf16.msra.mxu0 %v1346_v10  ;;  %v1363_v27 = vld [vmem:[#allocation6 + $0x88] sm:$0xff]   ;;  %v1367_v31 = vld [vmem:[#allocation6 + $0x80] sm:$0xff]   ;;  %v1370_v42 = vld [vmem:[#allocation6 + $0x138] sm:$0xff]  }
  0x40   :  { %1204 = vmatpush3.bf16.msra.mxu1 %v1347_v11  ;;  %1183 = vmatprep.subr.bf16.mxu0 %v1348_v12  ;;  %v91_v32 = vld [vmem:[#allocation3] sm:$0xff]  ;;  %v92_v34 = vld [vmem:[#allocation3 + $0x8] sm:$0xff]  ;;  %v1371_v43 = vld [vmem:[#allocation6 + $0x1b8] sm:$0xff]  }
  0x41   :  { %1205 = vmatprep.subr.bf16.mxu1 %v1349_v13  ;;  %v95_v33 = vld [vmem:[#allocation3 + $0x20] sm:$0xff]  ;;  %v96_v37 = vld [vmem:[#allocation3 + $0x28] sm:$0xff]  ;;  %v1372_v44 = vld [vmem:[#allocation6 + $0x170] sm:$0xff]  }
  0x42   :  { %v1086_v35 = vcombine.low %v91_v32, %v95_v33  ;;  %v1087_v36 = vcombine.high %v91_v32, %v95_v33  ;;  %v1088_v38 = vcombine.low %v92_v34, %v96_v37  ;;  %v1089_v39 = vcombine.high %v92_v34, %v96_v37  ;;  %v1373_v45 = vld [vmem:[#allocation6 + $0x1f0] sm:$0xff]   ;;  %v1376_v48 = vld [vmem:[#allocation6 + $0x168] sm:$0xff]   ;;  %v1380_v52 = vld [vmem:[#allocation6 + $0x160] sm:$0xff]  }
  0x43   :  { %1184 = vmatpush3.bf16.msra.mxu0 %v1350_v14  ;;  %v1374_v46 = vld [vmem:[#allocation6 + $0x130] sm:$0xff]   ;;  %v1377_v49 = vld [vmem:[#allocation6 + $0x1e8] sm:$0xff]   ;;  %v1381_v53 = vld [vmem:[#allocation6 + $0x1e0] sm:$0xff]  }
  0x44   :  { %1206 = vmatpush3.bf16.msra.mxu1 %v1351_v15  ;;  %1185 = vmatprep.subr.bf16.mxu0 %v1352_v16  ;;  %v1375_v47 = vld [vmem:[#allocation6 + $0x1b0] sm:$0xff]   ;;  %v1378_v50 = vld [vmem:[#allocation6 + $0x128] sm:$0xff]   ;;  %v1382_v54 = vld [vmem:[#allocation6 + $0x120] sm:$0xff]  }
  0x45   :  { %1207 = vmatprep.subr.bf16.mxu1 %v1353_v17  ;;  %683 = vmatprep.mubr.bf16.mxu0 %v1087_v36  ;;  %v1379_v51 = vld [vmem:[#allocation6 + $0x1a8] sm:$0xff]   ;;  %v1383_v55 = vld [vmem:[#allocation6 + $0x1a0] sm:$0xff]   ;;  %v1384_v56 = vld [vmem:[#allocation6 + $0x158] sm:$0xff]   ;;  %v1532_v17 = vmov 0.0  }
  0x46   :  { %724 = vmatprep.mubr.bf16.mxu1 %v1089_v39  ;;  %v1385_v57 = vld [vmem:[#allocation6 + $0x1d8] sm:$0xff]   ;;  %v1388_v60 = vld [vmem:[#allocation6 + $0x150] sm:$0xff]   ;;  %v1392_v0 = vld [vmem:[#allocation6 + $0x148] sm:$0xff]  }
  0x47   :  { %1186 = vmatpush3.bf16.msra.mxu0 %v1354_v18  ;;  %v1386_v58 = vld [vmem:[#allocation6 + $0x118] sm:$0xff]   ;;  %v1389_v61 = vld [vmem:[#allocation6 + $0x1d0] sm:$0xff]   ;;  %v1393_v1 = vld [vmem:[#allocation6 + $0x1c8] sm:$0xff]  }
  0x48   :  { %1208 = vmatpush3.bf16.msra.mxu1 %v1355_v19  ;;  %1187 = vmatprep.subr.bf16.mxu0 %v1356_v20  ;;  %v1387_v59 = vld [vmem:[#allocation6 + $0x198] sm:$0xff]   ;;  %v1390_v62 = vld [vmem:[#allocation6 + $0x110] sm:$0xff]   ;;  %v1394_v2 = vld [vmem:[#allocation6 + $0x108] sm:$0xff]  }
  0x49   :  { %1209 = vmatprep.subr.bf16.mxu1 %v1357_v21  ;;  %v1391_v63 = vld [vmem:[#allocation6 + $0x190] sm:$0xff]   ;;  %v1395_v3 = vld [vmem:[#allocation6 + $0x188] sm:$0xff]   ;;  %v1396_v4 = vld [vmem:[#allocation6 + $0x140] sm:$0xff]  }
  0x4a   :  { %v1397_v5 = vld [vmem:[#allocation6 + $0x1c0] sm:$0xff]   ;;  %v93_v8 = vld [vmem:[#allocation3 + $0x10] sm:$0xff]  ;;  %v94_v12 = vld [vmem:[#allocation3 + $0x18] sm:$0xff] }
  0x4b   :  { %1188 = vmatpush3.bf16.msra.mxu0 %v1358_v22  ;;  %v1398_v6 = vld [vmem:[#allocation6 + $0x100] sm:$0xff]   ;;  %v97_v9 = vld [vmem:[#allocation3 + $0x30] sm:$0xff]  ;;  %v98_v13 = vld [vmem:[#allocation3 + $0x38] sm:$0xff] }
  0x4c   :  { %1210 = vmatpush3.bf16.msra.mxu1 %v1359_v23  ;;  %1189 = vmatprep.subr.bf16.mxu0 %v1360_v24  ;;  %v1399_v7 = vld [vmem:[#allocation6 + $0x180] sm:$0xff]   ;;  %v1090_v10 = vcombine.low %v93_v8, %v97_v9  ;;  %v1091_v11 = vcombine.high %v93_v8, %v97_v9  ;;  %v1092_v14 = vcombine.low %v94_v12, %v98_v13  ;;  %v1400_v16 = vld [vmem:[#allocation8 + $0x38] sm:$0xff]   ;;  %v1401_v18 = vld [vmem:[#allocation8 + $0x30] sm:$0xff]  }
  0x4d   :  { %1211 = vmatprep.subr.bf16.mxu1 %v1361_v25  ;;  %v1093_v15 = vcombine.high %v94_v12, %v98_v13  ;;  %v1402_v19 = vld [vmem:[#allocation8 + $0x28] sm:$0xff]   ;;  %v1403_v20 = vld [vmem:[#allocation8 + $0x20] sm:$0xff]   ;;  %v1404_v21 = vld [vmem:[#allocation8 + $0x18] sm:$0xff]  }
  0x4e   :  { %v1405_v22 = vld [vmem:[#allocation8 + $0x10] sm:$0xff]   ;;  %v1406_v23 = vld [vmem:[#allocation8 + $0x8] sm:$0xff]   ;;  %v1407_v24 = vld [vmem:[#allocation8] sm:$0xff]  }
  0x4f   :  { %1190 = vmatpush3.bf16.msra.mxu0 %v1362_v26  ;;  %v1408_v25 = vld [vmem:[#allocation9 + $0x38] sm:$0xff]   ;;  %v1409_v26 = vld [vmem:[#allocation9 + $0x30] sm:$0xff]  }
  0x50   :  { %1212 = vmatpush3.bf16.msra.mxu1 %v1363_v27  ;;  %1191 = vmatprep.subr.bf16.mxu0 %v1364_v28  ;;  %v1410_v27 = vld [vmem:[#allocation9 + $0x28] sm:$0xff]   ;;  %v1411_v28 = vld [vmem:[#allocation9 + $0x20] sm:$0xff]  }
  0x51   :  { %1213 = vmatprep.subr.bf16.mxu1 %v1365_v29  ;;  %v1412_v29 = vld [vmem:[#allocation9 + $0x18] sm:$0xff]  }
  0x53   :  { %1192 = vmatpush3.bf16.msra.mxu0 %v1366_v30 }
  0x54   :  { %1214 = vmatpush3.bf16.msra.mxu1 %v1367_v31  ;;  %1221 = vmatprep.subr.bf16.mxu0 %v1368_v40 }
  0x55   :  { %1243 = vmatprep.subr.bf16.mxu1 %v1369_v41 }
  0x56   :  { %684 = vmatmul.mubr.bf16.vlgmr.msra.gmra.mxu0 %v1086_v35 }
  0x57   :  { %725 = vmatmul.mubr.bf16.vlgmr.msra.gmra.mxu1 %v1088_v38  ;;  %1222 = vmatpush3.bf16.msra.mxu0 %v1370_v42 }
  0x58   :  { %1244 = vmatpush3.bf16.msra.mxu1 %v1371_v43  ;;  %1223 = vmatprep.subr.bf16.mxu0 %v1372_v44 }
  0x59   :  { %1245 = vmatprep.subr.bf16.mxu1 %v1373_v45  ;;  %765 = vmatprep.mubr.bf16.mxu0 %v1091_v11 }
  0x5a   :  { %806 = vmatprep.mubr.bf16.mxu1 %v1093_v15  ;;  %v1168_v15 = vld [vmem:[%s1634_s6] ss:$0 sm:$0xff] }
  0x5b   :  { %1224 = vmatpush3.bf16.msra.mxu0 %v1374_v46 }
  0x5c   :  { %1246 = vmatpush3.bf16.msra.mxu1 %v1375_v47  ;;  %1225 = vmatprep.subr.bf16.mxu0 %v1376_v48 }
  0x5d   :  { %1247 = vmatprep.subr.bf16.mxu1 %v1377_v49 }
  0x5f   :  { %1226 = vmatpush3.bf16.msra.mxu0 %v1378_v50 }
  0x60   :  { %1248 = vmatpush3.bf16.msra.mxu1 %v1379_v51  ;;  %1227 = vmatprep.subr.bf16.mxu0 %v1380_v52 }
  0x61   :  { %1249 = vmatprep.subr.bf16.mxu1 %v1381_v53 }
  0x63   :  { %1228 = vmatpush3.bf16.msra.mxu0 %v1382_v54 }
  0x64   :  { %1250 = vmatpush3.bf16.msra.mxu1 %v1383_v55  ;;  %1229 = vmatprep.subr.bf16.mxu0 %v1384_v56 }
  0x65   :  { %1251 = vmatprep.subr.bf16.mxu1 %v1385_v57 }
  0x67   :  { %1230 = vmatpush3.bf16.msra.mxu0 %v1386_v58 }
  0x68   :  { %1252 = vmatpush3.bf16.msra.mxu1 %v1387_v59  ;;  %1231 = vmatprep.subr.bf16.mxu0 %v1388_v60  ;;  %v1158_v59 = vld [vmem:[%s1630_s2] ss:$0 sm:$0xff] }
  0x69   :  { %1253 = vmatprep.subr.bf16.mxu1 %v1389_v61 }
  0x6b   :  { %1232 = vmatpush3.bf16.msra.mxu0 %v1390_v62 }
  0x6c   :  { %1254 = vmatpush3.bf16.msra.mxu1 %v1391_v63  ;;  %1233 = vmatprep.subr.bf16.mxu0 %v1392_v0  ;;  %v1413_v0 = vld [vmem:[#allocation9 + $0x10] sm:$0xff]  }
  0x6d   :  { %1255 = vmatprep.subr.bf16.mxu1 %v1393_v1  ;;  %v1414_v1 = vld [vmem:[#allocation9 + $0x8] sm:$0xff]  }
  0x6f   :  { %1234 = vmatpush3.bf16.msra.mxu0 %v1394_v2  ;;  %v1415_v2 = vld [vmem:[#allocation9] sm:$0xff]  }
  0x70   :  { %1256 = vmatpush3.bf16.msra.mxu1 %v1395_v3  ;;  %1235 = vmatprep.subr.bf16.mxu0 %v1396_v4  ;;  %v1159_v3 = vld [vmem:[%s1631_s3] ss:$0 sm:$0xff]  ;;  %s1534_s3 = smov [#allocation11]  }
  0x71   :  { %1257 = vmatprep.subr.bf16.mxu1 %v1397_v5  ;;  %s1072_s26 = sshll.u32 %s1534_s3, 4  ;;  %s1073_s26 = int_to_ptr.vmem [resolvable:$true] %s1072_s26 }
  0x72   :  { %s1496_s27 = scalar_lea.vmem %s1073_s26, 256  ;;  %p1501_p7 = scmp.lt.s32.totalorder %s1073_s26, %s1073_s26 }
  0x73   :  { %1236 = vmatpush3.bf16.msra.mxu0 %v1398_v6  ;;  %p1497_p6 = scmp.ne.s32.totalorder %s1073_s26, %s1496_s27  ;;  %p1502_p8 = scmp.lt.s32.totalorder %s1496_s27, %s1496_s27 }
  0x74   :  { %1258 = vmatpush3.bf16.msra.mxu1 %v1399_v7  ;;  %1283 = vmatprep.subr.bf16.mxu0 %v1532_v17 }
  0x75   :  { %1303 = vmatprep.subr.bf16.mxu1 %v1532_v17  ;;  %p1503_p9 = por %p1502_p8, %p1501_p7 }
  0x76   :  { %766 = vmatmul.mubr.bf16.vlgmr.msra.gmra.mxu0 %v1090_v10 }
  0x77   :  { %807 = vmatmul.mubr.bf16.vlgmr.msra.gmra.mxu1 %v1092_v14  ;;  %1284 = vmatpush3.bf16.msra.mxu0 %v1400_v16  ;;  %p1504_p10 = pnand %p1503_p9, %p1497_p6 }
  0x78   :  { %1285 = vmatprep.subr.bf16.mxu0 %v1532_v17  ;;  %1299 = vmatprep.mubr.msk.bf16.mxu0 %vm1533_vm0, %v1532_v17 }
  0x79   :  { %1319 = vmatprep.mubr.msk.bf16.mxu1 %vm1533_vm0, %v1532_v17  ;;  %1304 = vmatpush3.bf16.msra.mxu1 %v1408_v25 }
  0x7a   :  { %1305 = vmatprep.subr.bf16.mxu1 %v1532_v17 }
  0x7b   :  { %1286 = vmatpush3.bf16.msra.mxu0 %v1401_v18 }
  0x7c   :  { %1287 = vmatprep.subr.bf16.mxu0 %v1532_v17 }
  0x7d   :  { %1306 = vmatpush3.bf16.msra.mxu1 %v1409_v26 }
  0x7e   :  { %1307 = vmatprep.subr.bf16.mxu1 %v1532_v17 }
  0x7f   :  { %1288 = vmatpush3.bf16.msra.mxu0 %v1402_v19 }
  0x80   :  { %1289 = vmatprep.subr.bf16.mxu0 %v1532_v17 }
  0x81   :  { %1308 = vmatpush3.bf16.msra.mxu1 %v1410_v27 }
  0x82   :  { %1309 = vmatprep.subr.bf16.mxu1 %v1532_v17 }
  0x83   :  { %1290 = vmatpush3.bf16.msra.mxu0 %v1403_v20 }
  0x84   :  { %1291 = vmatprep.subr.bf16.mxu0 %v1532_v17 }
  0x85   :  { %1310 = vmatpush3.bf16.msra.mxu1 %v1411_v28 }
  0x86   :  { %1311 = vmatprep.subr.bf16.mxu1 %v1532_v17 }
  0x87   :  { %1292 = vmatpush3.bf16.msra.mxu0 %v1404_v21 }
  0x88   :  { %1293 = vmatprep.subr.bf16.mxu0 %v1532_v17 }
  0x89   :  { %1312 = vmatpush3.bf16.msra.mxu1 %v1412_v29 }
  0x8a   :  { %1313 = vmatprep.subr.bf16.mxu1 %v1532_v17 }
  0x8b   :  { %1294 = vmatpush3.bf16.msra.mxu0 %v1405_v22 }
  0x8c   :  { %1295 = vmatprep.subr.bf16.mxu0 %v1532_v17 }
  0x8d   :  { %1314 = vmatpush3.bf16.msra.mxu1 %v1413_v0 }
  0x8e   :  { %1315 = vmatprep.subr.bf16.mxu1 %v1532_v17 }
  0x8f   :  { %1296 = vmatpush3.bf16.msra.mxu0 %v1406_v23 }
  0x90   :  { %1297 = vmatprep.subr.bf16.mxu0 %v1532_v17 }
  0x91   :  { %1316 = vmatpush3.bf16.msra.mxu1 %v1414_v1 }
  0x92   :  { %1317 = vmatprep.subr.bf16.mxu1 %v1532_v17 }
  0x93   :  { %1298 = vmatpush3.bf16.msra.mxu0 %v1407_v24 }
  0x95   :  { %1318 = vmatpush3.bf16.msra.mxu1 %v1415_v2 }
 0x116   :  { %v1193_v30 = vpop.f32.mrf.mxu0 }
 0x117   :  { %v1215_v31 = vpop.f32.mrf.mxu1 }
 0x118   :  { %v1194_v32 = vpop.f32.mrf.mxu0 }
 0x119   :  { %v1216_v33 = vpop.f32.mrf.mxu1  ;;  %v1195_v37 = vadd.f32 %v1194_v32, %v1193_v30 }
 0x11a   :  { %v1196_v34 = vpop.f32.mrf.mxu0  ;;  %v1217_v38 = vadd.f32 %v1216_v33, %v1215_v31 }
 0x11b   :  { %v1218_v35 = vpop.f32.mrf.mxu1 }
 0x11c   :  { %v1197_v36 = vpop.f32.mrf.mxu0  ;;  %v727_v43 = vadd.f32 %v1217_v38, %v1195_v37 }
 0x11d   :  { %v1219_v39 = vpop.f32.mrf.mxu1  ;;  %v1198_v44 = vadd.f32 %v1197_v36, %v1196_v34 }
 0x11e   :  { %v1220_v45 = vadd.f32 %v1219_v39, %v1218_v35 }
 0x120   :  { %v730_v52 = vadd.f32 %v1220_v45, %v1198_v44 }
 0x136   :  { %v1237_v40 = vpop.f32.mrf.mxu0 }
 0x137   :  { %v1259_v41 = vpop.f32.mrf.mxu1 }
 0x138   :  { %v1238_v42 = vpop.f32.mrf.mxu0 }
 0x139   :  { %v1239_v46 = vadd.f32 %v1238_v42, %v1237_v40  ;;  %v1260_v47 = vpop.f32.mrf.mxu1 }
 0x13a   :  { %v1240_v48 = vpop.f32.mrf.mxu0  ;;  %v1261_v53 = vadd.f32 %v1260_v47, %v1259_v41 }
 0x13b   :  { %v768_v49 = vadd.f32 %v1239_v46, %v727_v43  ;;  %v1262_v50 = vpop.f32.mrf.mxu1 }
 0x13c   :  { %v1241_v51 = vpop.f32.mrf.mxu0 }
 0x13d   :  { %v1242_v54 = vadd.f32 %v1241_v51, %v1240_v48  ;;  %v1263_v55 = vpop.f32.mrf.mxu1  ;;  %v809_v56 = vadd.f32 %v1261_v53, %v768_v49 }
 0x13e   :  { %v1264_v58 = vadd.f32 %v1263_v55, %v1262_v50 }
 0x13f   :  { %v771_v57 = vadd.f32 %v1242_v54, %v730_v52  ;;  %v831_v61 = vadd.f32 %v1158_v59, %v809_v56 }
 0x141   :  { %v812_v60 = vadd.f32 %v1264_v58, %v771_v57 }
 0x143   :  { %v832_v62 = vadd.f32 %v1158_v59, %v812_v60 }
 0x145   :  { %v833_v63 = vpack.c.bf16 %v832_v62, %v831_v61 }
 0x147   :  { %1300 = vmatmul.mubr.bf16.vlgmr.msra.gmra.mxu0 %v833_v63 }
 0x207   :  { %v939_v4 = vpop.f32.mrf.mxu0 }
 0x208   :  { %v940_v5 = vadd.f32 %v1159_v3, %v939_v4 }
 0x209   :  { %v1301_v6 = vpop.f32.mrf.mxu0 }
 0x20a   :  { %v948_v8 = vmul.f32 0.2, %v940_v5  ;;  %vm946_vm1 = vcmp.ge.f32.partialorder %v940_v5, 0.0 }
 0x20b   :  { %v942_v7 = vpop.f32.mrf.mxu0 }
 0x20c   :  { %v943_v9 = vadd.f32 %v1159_v3, %v942_v7  ;;  %v950_v12 = vsel %vm946_vm1, %v940_v5, %v948_v8 }
 0x20d   :  { %v1302_v10 = vpop.f32.mrf.mxu0 }
 0x20e   :  { %vm947_vm2 = vcmp.ge.f32.partialorder %v943_v9, 0.0  ;;  %v949_v11 = vmul.f32 0.2, %v943_v9 }
 0x210   :  { %v951_v13 = vsel %vm947_vm2, %v943_v9, %v949_v11 }
 0x211   :  { %v952_v14 = vpack.c.bf16 %v951_v13, %v950_v12 }
 0x213   :  { %1320 = vmatmul.mubr.bf16.vlgmr.msra.gmra.mxu1 %v952_v14 }
 0x2d3   :  { %v1058_v16 = vpop.f32.mrf.mxu1 }
 0x2d4   :  { %v1059_v17 = vadd.f32 %v1168_v15, %v1058_v16 }
 0x2d5   :  { %v1321_v18 = vpop.f32.mrf.mxu1 }
 0x2d6   :  { %1065 = vst [vmem:[#allocation11] sm:$0xff] %v1059_v17 }
 0x2d7   :  { %v1061_v19 = vpop.f32.mrf.mxu1 }
 0x2d8   :  { %v1062_v20 = vadd.f32 %v1168_v15, %v1061_v19 }
 0x2d9   :  { %v1322_v21 = vpop.f32.mrf.mxu1 }
 0x2da   :  { %1066 = vst [vmem:[#allocation11 + $0x8] sm:$0xff] %v1062_v20 }
 0x2db   :  { %1507 = shalt.err (!%p1504_p10)
}
 0x2dc   :  { %s1535_s28 = smov 128   ;;  %s1536_s6 = smov 8  }
 0x2dd   :  { %1078 = dma.vmem_to_hbm [thread:$0]  %s1073_s26, 256, %s1635_s7, [#allocation5], %s1535_s28, %s1535_s28, %s1536_s6  }
 0x2de   :  { %1522 = dma.done.wait [#allocation5], 256  }
 0x2df   :  { %1523 = vsyncadd [#allocation5], 4294967040 }
 0x2e0   :  { %1082 = vsyncpa [#allocation4], 1 }
 0x2e1   :  { %1083 = vsyncpa [#allocation7], 1 }
 0x2e2   :  { %1084 = vsyncpa [#allocation10], 1 }
 0x2e3   :  { %1085 = vsyncpa [#allocation5], 1 }

</bundles_post_ra>
